<compile_context>
chip_gen: v6e
topology: v6e:2x2x1
jax: 0.10.0
libtpu: 0.0.40
codegen_flags: <defaults>
</compile_context>

<pallas_src>
import numpy as np
import jax
import jax.numpy as jnp
from jax import lax
from jax.experimental import pallas as pl
from jax.experimental.pallas import tpu as pltpu


# ----------------------------------------------------------------------------
# Weight-slab layout (bf16), row offsets (8-aligned), columns start at 0:
#   W1_big  (392,  64) @ rows   0   conv1 as dense map  x(64) -> y1(7*7*8)
#   W2_big  (256, 328) @ rows 392   conv2 as dense map  m1(pitch-7 rows) -> y2(4*4*16)
#   w_conv  (  1, 176) @ row  648   folded fc tail, conv-feature part (pool2 scatter folded in)
#   w_act   (  1,   5) @ row  656   folded fc tail + action branch, action part
#   -> slab (664, 328) bf16
# Bias-slab (f32, single column): b1_big 0(392), b2_big 392(256), scalar 648 -> (656, 1)
# ----------------------------------------------------------------------------
def value_kernel(x_ref, act_ref, w_ref, b_ref, o_ref):
    f32 = jnp.float32
    bf16 = jnp.bfloat16
    NT = (((1,), (1,)), ((), ()))          # contract last dim of both operands

    x = x_ref[...].astype(bf16)            # (TB, 64)   row = batch, col = h*8+w
    act = act_ref[...].astype(bf16)        # (TB, 5)

    # ---- conv1 (1->8, 2x2, VALID) as one dense NT matmul --------------------
    # y1 rows ordered (i*7 + j)*8 + o, i,j in 0..6
    y1 = lax.dot_general(w_ref[0:392, 0:64], x, NT,
                         preferred_element_type=f32) + b_ref[0:392, 0:1]   # (392, TB)

    # ---- max_pool2d(2, stride=1): two shifted maxima (sublane-aligned) ------
    a = jnp.maximum(y1[0:384, :], y1[8:392, :])     # max over kw  (+8  = j+1)
    m1 = jnp.maximum(a[0:328, :], a[56:384, :])     # max over kh  (+56 = i+1); pitch-7 rows

    # ---- conv2 (8->16, 3x3, VALID) as one dense matmul -----------------------
    # W2_big has zero columns for the pitch-7 "junk" rows of m1.
    # y2 rows ordered (i2*4 + j2)*16 + o2, i2,j2 in 0..3
    y2 = jnp.dot(w_ref[392:648, 0:328], m1.astype(bf16),
                 preferred_element_type=f32) + b_ref[392:648, 0:1]         # (256, TB)

    # ---- max_pool2d(2, stride=2): two shifted maxima --------------------------
    c = jnp.maximum(y2[0:240, :], y2[16:256, :])    # max over dj (+16)
    d = jnp.maximum(c[0:176, :], c[64:240, :])      # max over di (+64); pooled cells at rows 0/32/128/160

    # ---- folded affine tail: fc4∘fc3∘fc2∘fc1 over [flatten(v2), afc2(afc1(a))] ---
    out = (jnp.dot(w_ref[648:649, 0:176], d.astype(bf16), preferred_element_type=f32)
           + lax.dot_general(w_ref[656:657, 0:5], act, NT, preferred_element_type=f32)
           + b_ref[648:649, 0:1])                   # (1, TB) lane-dense
    o_ref[...] = out


# ----------------------------------------------------------------------------
# One-time host-side parameter re-layout + exact affine fold (NOT per call).
# Takes PyTorch-layout params, returns (weight_slab bf16, bias_slab f32).
# ----------------------------------------------------------------------------
def prepare_params(p):
    f64 = np.float64
    WS = np.zeros((664, 328), np.float32)
    BS = np.zeros((656, 1), np.float32)

    # conv1 -> dense Toeplitz (output row (i*7+j)*8+o, input col h*8+w)
    w1 = np.asarray(p["c1w"], np.float32)        # (8,1,2,2)
    b1 = np.asarray(p["c1b"], np.float32)
    for i in range(7):
        for j in range(7):
            for o in range(8):
                r = (i * 7 + j) * 8 + o
                BS[r, 0] = b1[o]
                for kh in range(2):
                    for kw in range(2):
                        WS[r, (i + kh) * 8 + (j + kw)] = w1[o, 0, kh, kw]

    # conv2 -> dense Toeplitz; input columns follow the pitch-7 pooled layout
    w2 = np.asarray(p["c2w"], np.float32)        # (16,8,3,3)
    b2 = np.asarray(p["c2b"], np.float32)
    for i2 in range(4):
        for j2 in range(4):
            for o2 in range(16):
                r = (i2 * 4 + j2) * 16 + o2
                BS[392 + r, 0] = b2[o2]
                for kh in range(3):
                    for kw in range(3):
                        for ci in range(8):
                            col = ((i2 + kh) * 7 + (j2 + kw)) * 8 + ci
                            WS[392 + r, col] = w2[o2, ci, kh, kw]

    # ---- exact fold of the affine tail (no nonlinearities in the module) ----
    f1w = np.asarray(p["f1w"], f64); f1b = np.asarray(p["f1b"], f64)
    f2w = np.asarray(p["f2w"], f64); f2b = np.asarray(p["f2b"], f64)
    f3w = np.asarray(p["f3w"], f64); f3b = np.asarray(p["f3b"], f64)
    f4w = np.asarray(p["f4w"], f64); f4b = np.asarray(p["f4b"], f64)
    a1w = np.asarray(p["a1w"], f64); a1b = np.asarray(p["a1b"], f64)
    a2w = np.asarray(p["a2w"], f64); a2b = np.asarray(p["a2b"], f64)

    M = f4w @ f3w @ f2w @ f1w                                    # (1, 164)
    b_tail = f4w @ (f3w @ (f2w @ f1b + f2b) + f3b) + f4b         # (1,)
    M_conv, M_act2 = M[:, :64], M[:, 64:]                        # (1,64), (1,100)
    W_act = M_act2 @ a2w @ a1w                                   # (1, 5)
    b_total = b_tail + M_act2 @ (a2w @ a1b + a2b)                # (1,)

    # fused conv row: scatter PyTorch flatten order (c*4 + I*2 + J) to the
    # pooled-row positions of `d` ((2I*4 + 2J)*16 + c); junk columns stay 0.
    for o2 in range(16):
        for I in range(2):
            for J in range(2):
                WS[648, (2 * I * 4 + 2 * J) * 16 + o2] = M_conv[0, o2 * 4 + I * 2 + J]
    WS[656, 0:5] = W_act[0]
    BS[648, 0] = b_total[0]

    return jnp.asarray(WS).astype(jnp.bfloat16), jnp.asarray(BS)


# ----------------------------------------------------------------------------
# Batch lane-tile policy (generation-agnostic; see header notes).
# ----------------------------------------------------------------------------
def _pick_tile(B):
    if B <= 128:
        return B                                   # one full-extent block, no padding
    # keep >=2 grid steps (v7x: 2 TCs) and cap at 256 (MXU N-width on v6e/v7x,
    # v5e sweet spot); multiples of 128 so only the last block can be ragged.
    return max(128, min(256, (B // 2) // 128 * 128))


# ----------------------------------------------------------------------------
# Wrapper: per-call glue is only a (B,1,8,8)->(B,64) reshape + pallas_call.
# ----------------------------------------------------------------------------
def value_forward(x_nchw, action, prepared):
    wslab, bslab = prepared
    B = x_nchw.shape[0]
    x2 = x_nchw.reshape(B, 64).astype(jnp.float32)       # row-major: col = h*8 + w
    act = action.astype(jnp.float32)

    TB = _pick_tile(B)
    grid = pl.cdiv(B, TB)

    out = pl.pallas_call(
        value_kernel,
        out_shape=jax.ShapeDtypeStruct((1, B), jnp.float32),
        grid_spec=pltpu.PrefetchScalarGridSpec(
            num_scalar_prefetch=0,
            grid=(grid,),
            in_specs=[
                pl.BlockSpec((TB, 64), lambda b: (b, 0)),
                pl.BlockSpec((TB, 5), lambda b: (b, 0)),
                pl.BlockSpec(wslab.shape, lambda b: (0, 0)),   # VMEM-resident weights
                pl.BlockSpec(bslab.shape, lambda b: (0, 0)),   # VMEM-resident biases
            ],
            out_specs=pl.BlockSpec((1, TB), lambda b: (0, b)),
        ),
        compiler_params=pltpu.CompilerParams(
            dimension_semantics=("parallel",)),
    )(x2, act, wslab, bslab)

    return out.reshape(B, 1)                              # (1,B) -> (B,1)


# ----------------------------------------------------------------------------
# Deterministic parameter init (PyTorch-style uniform bounds), PyTorch layouts.
# ----------------------------------------------------------------------------
def init_params(key):
    def lin(k, out_f, in_f):
        k1, k2 = jax.random.split(k)
        b = 1.0 / (in_f ** 0.5)
        w = jax.random.uniform(k1, (out_f, in_f), jnp.float32, -b, b)
        bias = jax.random.uniform(k2, (out_f,), jnp.float32, -b, b)
        return w, bias

    def conv(k, out_c, in_c, ksz):
        k1, k2 = jax.random.split(k)
        b = 1.0 / ((in_c * ksz * ksz) ** 0.5)
        w = jax.random.uniform(k1, (out_c, in_c, ksz, ksz), jnp.float32, -b, b)
        bias = jax.random.uniform(k2, (out_c,), jnp.float32, -b, b)
        return w, bias

    ks = jax.random.split(key, 8)
    p = {}
    p["c1w"], p["c1b"] = conv(ks[0], 8, 1, 2)
    p["c2w"], p["c2b"] = conv(ks[1], 16, 8, 3)
    p["f1w"], p["f1b"] = lin(ks[2], 300, 164)
    p["f2w"], p["f2b"] = lin(ks[3], 100, 300)
    p["f3w"], p["f3b"] = lin(ks[4], 20, 100)
    p["f4w"], p["f4b"] = lin(ks[5], 1, 20)
    p["a1w"], p["a1b"] = lin(ks[6], 30, 5)
    p["a2w"], p["a2b"] = lin(ks[7], 100, 30)
    return p


# ----------------------------------------------------------------------------
# Pure-JAX f32 reference (matches PyTorch semantics, NCHW) for verification.
# ----------------------------------------------------------------------------
def value_reference(x_nchw, action, p):
    dn = ("NCHW", "OIHW", "NCHW")
    v = lax.conv_general_dilated(x_nchw, p["c1w"], (1, 1), "VALID",
                                 dimension_numbers=dn) + p["c1b"][None, :, None, None]
    v = lax.reduce_window(v, -jnp.inf, lax.max, (1, 1, 2, 2), (1, 1, 1, 1), "VALID")
    v = lax.conv_general_dilated(v, p["c2w"], (1, 1), "VALID",
                                 dimension_numbers=dn) + p["c2b"][None, :, None, None]
    v = lax.reduce_window(v, -jnp.inf, lax.max, (1, 1, 2, 2), (1, 1, 2, 2), "VALID")
    a3 = v.reshape(v.shape[0], -1)                                  # (B, 64)
    act1 = action @ p["a1w"].T + p["a1b"]
    act2 = act1 @ p["a2w"].T + p["a2b"]
    allx = jnp.concatenate([a3, act2], axis=1)                      # (B, 164)
    h1 = allx @ p["f1w"].T + p["f1b"]
    h2 = h1 @ p["f2w"].T + p["f2b"]
    h3 = h2 @ p["f3w"].T + p["f3b"]
    return h3 @ p["f4w"].T + p["f4b"]


if __name__ == "__main__":
    key = jax.random.PRNGKey(0)
    kx, ka, kp = jax.random.split(key, 3)

    B = 2
    x = jax.random.normal(kx, (B, 1, 8, 8), jnp.float32)    # 8x8 board, 1 channel
    action = jax.random.normal(ka, (B, 5), jnp.float32)     # 5-dim action
    params = init_params(kp)

    prepared = prepare_params(params)                        # one-time re-layout + fold
    out = value_forward(x, action, prepared)
    out = jax.block_until_ready(out)

    ref = value_reference(x, action, params)
    assert out.shape == (B, 1), out.shape
    # bf16 MXU operands (f32 accumulation) are intentional -> tolerance looser
    # than the pure-f32 version; errors from any structural bug would be O(0.1+).
    assert jnp.allclose(out, ref, atol=2e-2, rtol=2e-2), (out, ref)

    print("KERNEL_OK")
</pallas_src>

<mosaic_0001>
module attributes {stable_mosaic.version = 11 : i64} {
  func.func @value_kernel(%arg0: i32, %arg1: memref<2x64xf32, #tpu.memory_space<vmem>>, %arg2: memref<2x5xf32, #tpu.memory_space<vmem>>, %arg3: memref<664x328xbf16, #tpu.memory_space<vmem>>, %arg4: memref<656x1xf32, #tpu.memory_space<vmem>>, %arg5: memref<1x2xf32, #tpu.memory_space<vmem>>) attributes {dimension_semantics = [#tpu.dimension_semantics<parallel>], iteration_bounds = array<i64: 1>, scalar_prefetch = 0 : i64, scratch_operands = 0 : i64, tpu.core_type = #tpu.core_type<tc>, window_params = [{transform_indices = @transform_0, window_bounds = array<i64: 2, 64>}, {transform_indices = @transform_1, window_bounds = array<i64: 2, 5>}, {pipeline_mode = #tpu.pipeline_mode<synchronous>, transform_indices = @transform_2, window_bounds = array<i64: 664, 328>}, {pipeline_mode = #tpu.pipeline_mode<synchronous>, transform_indices = @transform_3, window_bounds = array<i64: 656, 1>}, {transform_indices = @transform_4, window_bounds = array<i64: 1, 2>}]} {
    %c0 = arith.constant 0 : index
    %c0_0 = arith.constant 0 : index
    %0 = vector.load %arg1[%c0, %c0_0] : memref<2x64xf32, #tpu.memory_space<vmem>>, vector<2x64xf32>
    %1 = arith.truncf %0 : vector<2x64xf32> to vector<2x64xbf16>
    %c0_1 = arith.constant 0 : index
    %c0_2 = arith.constant 0 : index
    %2 = vector.load %arg2[%c0_1, %c0_2] : memref<2x5xf32, #tpu.memory_space<vmem>>, vector<2x5xf32>
    %3 = arith.truncf %2 : vector<2x5xf32> to vector<2x5xbf16>
    %c0_3 = arith.constant 0 : index
    %c0_4 = arith.constant 0 : index
    %4 = vector.load %arg3[%c0_3, %c0_4] : memref<664x328xbf16, #tpu.memory_space<vmem>>, vector<392x64xbf16>
    %cst = arith.constant dense<0.000000e+00> : vector<392x2xf32>
    %5 = tpu.matmul %4, %1, %cst {dimension_numbers = #tpu.dot_dimension_numbers<[1], [1], [0], [0], [0, 0, 1, 0], [], []>} : vector<392x64xbf16>, vector<2x64xbf16>, vector<392x2xf32> -> vector<392x2xf32>
    %c0_5 = arith.constant 0 : index
    %c0_6 = arith.constant 0 : index
    %6 = vector.load %arg4[%c0_5, %c0_6] : memref<656x1xf32, #tpu.memory_space<vmem>>, vector<392x1xf32>
    %7 = vector.broadcast %6 : vector<392x1xf32> to vector<392x2xf32>
    %8 = arith.addf %5, %7 : vector<392x2xf32>
    %9 = vector.extract_strided_slice %8 {offsets = [0, 0], sizes = [384, 2], strides = [1, 1]} : vector<392x2xf32> to vector<384x2xf32>
    %10 = vector.extract_strided_slice %8 {offsets = [8, 0], sizes = [384, 2], strides = [1, 1]} : vector<392x2xf32> to vector<384x2xf32>
    %11 = arith.maximumf %9, %10 : vector<384x2xf32>
    %12 = vector.extract_strided_slice %11 {offsets = [0, 0], sizes = [328, 2], strides = [1, 1]} : vector<384x2xf32> to vector<328x2xf32>
    %13 = vector.extract_strided_slice %11 {offsets = [56, 0], sizes = [328, 2], strides = [1, 1]} : vector<384x2xf32> to vector<328x2xf32>
    %14 = arith.maximumf %12, %13 : vector<328x2xf32>
    %c392 = arith.constant 392 : index
    %c0_7 = arith.constant 0 : index
    %15 = vector.load %arg3[%c392, %c0_7] : memref<664x328xbf16, #tpu.memory_space<vmem>>, vector<256x328xbf16>
    %16 = arith.truncf %14 : vector<328x2xf32> to vector<328x2xbf16>
    %cst_8 = arith.constant dense<0.000000e+00> : vector<256x2xf32>
    %17 = tpu.matmul %15, %16, %cst_8 {dimension_numbers = #tpu.dot_dimension_numbers<[1], [0], [0], [1], [0, 0, 1, 1], [], []>} : vector<256x328xbf16>, vector<328x2xbf16>, vector<256x2xf32> -> vector<256x2xf32>
    %c392_9 = arith.constant 392 : index
    %c0_10 = arith.constant 0 : index
    %18 = vector.load %arg4[%c392_9, %c0_10] : memref<656x1xf32, #tpu.memory_space<vmem>>, vector<256x1xf32>
    %19 = vector.broadcast %18 : vector<256x1xf32> to vector<256x2xf32>
    %20 = arith.addf %17, %19 : vector<256x2xf32>
    %21 = vector.extract_strided_slice %20 {offsets = [0, 0], sizes = [240, 2], strides = [1, 1]} : vector<256x2xf32> to vector<240x2xf32>
    %22 = vector.extract_strided_slice %20 {offsets = [16, 0], sizes = [240, 2], strides = [1, 1]} : vector<256x2xf32> to vector<240x2xf32>
    %23 = arith.maximumf %21, %22 : vector<240x2xf32>
    %24 = vector.extract_strided_slice %23 {offsets = [0, 0], sizes = [176, 2], strides = [1, 1]} : vector<240x2xf32> to vector<176x2xf32>
    %25 = vector.extract_strided_slice %23 {offsets = [64, 0], sizes = [176, 2], strides = [1, 1]} : vector<240x2xf32> to vector<176x2xf32>
    %26 = arith.maximumf %24, %25 : vector<176x2xf32>
    %c648 = arith.constant 648 : index
    %c0_11 = arith.constant 0 : index
    %27 = vector.load %arg3[%c648, %c0_11] : memref<664x328xbf16, #tpu.memory_space<vmem>>, vector<1x176xbf16>
    %28 = arith.truncf %26 : vector<176x2xf32> to vector<176x2xbf16>
    %cst_12 = arith.constant dense<0.000000e+00> : vector<1x2xf32>
    %29 = tpu.matmul %27, %28, %cst_12 {dimension_numbers = #tpu.dot_dimension_numbers<[1], [0], [0], [1], [0, 0, 1, 1], [], []>} : vector<1x176xbf16>, vector<176x2xbf16>, vector<1x2xf32> -> vector<1x2xf32>
    %c656 = arith.constant 656 : index
    %c0_13 = arith.constant 0 : index
    %30 = vector.load %arg3[%c656, %c0_13] : memref<664x328xbf16, #tpu.memory_space<vmem>>, vector<1x5xbf16>
    %cst_14 = arith.constant dense<0.000000e+00> : vector<1x2xf32>
    %31 = tpu.matmul %30, %3, %cst_14 {dimension_numbers = #tpu.dot_dimension_numbers<[1], [1], [0], [0], [0, 0, 1, 0], [], []>} : vector<1x5xbf16>, vector<2x5xbf16>, vector<1x2xf32> -> vector<1x2xf32>
    %32 = arith.addf %29, %31 : vector<1x2xf32>
    %c648_15 = arith.constant 648 : index
    %c0_16 = arith.constant 0 : index
    %33 = vector.load %arg4[%c648_15, %c0_16] : memref<656x1xf32, #tpu.memory_space<vmem>>, vector<1x1xf32>
    %34 = vector.broadcast %33 : vector<1x1xf32> to vector<1x2xf32>
    %35 = arith.addf %32, %34 : vector<1x2xf32>
    %c0_17 = arith.constant 0 : index
    %c0_18 = arith.constant 0 : index
    %36 = vector.load %arg5[%c0_17, %c0_18] : memref<1x2xf32, #tpu.memory_space<vmem>>, vector<1x2xf32>
    tpu.vector_store %arg5[%c0_17, %c0_18], %35 {strides = array<i32>} : memref<1x2xf32, #tpu.memory_space<vmem>>, vector<1x2xf32>,
    return
  }
  func.func @transform_0(%arg0: i32) -> (i32, i32) {
    %c0_i32 = arith.constant 0 : i32
    %c0_i32_0 = arith.constant 0 : i32
    return %arg0, %c0_i32 : i32, i32
  }
  func.func @transform_1(%arg0: i32) -> (i32, i32) {
    %c0_i32 = arith.constant 0 : i32
    %c0_i32_0 = arith.constant 0 : i32
    return %arg0, %c0_i32 : i32, i32
  }
  func.func @transform_2(%arg0: i32) -> (i32, i32) {
    %c0_i32 = arith.constant 0 : i32
    %c0_i32_0 = arith.constant 0 : i32
    %c0_i32_1 = arith.constant 0 : i32
    return %c0_i32, %c0_i32_0 : i32, i32
  }
  func.func @transform_3(%arg0: i32) -> (i32, i32) {
    %c0_i32 = arith.constant 0 : i32
    %c0_i32_0 = arith.constant 0 : i32
    %c0_i32_1 = arith.constant 0 : i32
    return %c0_i32, %c0_i32_0 : i32, i32
  }
  func.func @transform_4(%arg0: i32) -> (i32, i32) {
    %c0_i32 = arith.constant 0 : i32
    %c0_i32_0 = arith.constant 0 : i32
    return %c0_i32, %arg0 : i32, i32
  }
}

</mosaic_0001>

<bundles_post_ra>
// kernel: tpu_custom_call.1
= control target key start
LH: loop header
LB: loop body
LE: loop exit
PB: predicated region body
PF: predicated region fallthrough
CT: control target
= control target key end

     0   :  { %vm489_vm0 = vcmask 523264   ;;  %v2531_v2 = vmov 0.0   ;;  %v3562_v3 = vmov 0   ;;  %vm2533_vm1 = vmmov 0   ;;  %s3557_s0 = inlined_call_operand.vmem [shape: f32[2,64], index: 0, kind: input, shape index: {}]   ;;  %s3558_s1 = inlined_call_operand.vmem [shape: f32[2,5], index: 1, kind: input, shape index: {}]   ;;  %s3559_s2 = inlined_call_operand.vmem [shape: bf16[664,328], index: 2, kind: input, shape index: {}]   ;;  %s3560_s3 = inlined_call_operand.vmem [shape: f32[656,1], index: 3, kind: input, shape index: {}]   ;;  %s3561_s4 = inlined_call_operand.hbm [shape: f32[1,2], index: 4, kind: output, shape index: {}]  }
   0x1   :  { %v102_v0 = vld [vmem:[%s3560_s3 + $0xf0] sm:$0xff]  ;;  %v19_v1 = vld [vmem:[%s3557_s0] sm:$0x3]  ;;  %2245 = vmatprep.subr.bf16.mxu0 %v2531_v2  ;;  %2416 = vset.pattern.permute.xlu0 %v3562_v3  ;;  %v103_v7 = vld [vmem:[%s3560_s3 + $0xf8] sm:$0xff] }
   0x2   :  { %v20_v4 = vpack.c.bf16 %v19_v1, %v19_v1  ;;  %v104_v5 = vld [vmem:[%s3560_s3 + $0x100] sm:$0xff]  ;;  %273 = vperm.xlu0 %2416, %v102_v0   ;;  %2417 = vset.pattern.permute.xlu1 %v3562_v3  ;;  %v109_v8 = vld [vmem:[%s3560_s3 + $0x128] sm:$0xff]  ;;  %v110_v10 = vld [vmem:[%s3560_s3 + $0x130] sm:$0xff] }
   0x3   :  { %283 = vperm.xlu1 %2417, %v104_v5   ;;  %2247 = vmatprep.mubr.msk.bf16.mxu0 %vm2533_vm1, %v2531_v2  ;;  %v2418_v9 = vld [vmem:[%s3559_s2] ss:$12 sps:$4 sm:$0xff]   ;;  %v111_v11 = vld [vmem:[%s3560_s3 + $0x138] sm:$0xff]  ;;  %v86_v12 = vld [vmem:[%s3560_s3 + $0x70] sm:$0xff] }
   0x4   :  { %v566_v6 = vsel %vm489_vm0, %v20_v4, 0  ;;  %v87_v13 = vld [vmem:[%s3560_s3 + $0x78] sm:$0xff]  ;;  %v88_v15 = vld [vmem:[%s3560_s3 + $0x80] sm:$0xff]  ;;  %v93_v16 = vld [vmem:[%s3560_s3 + $0xa8] sm:$0xff] }
   0x5   :  { %2246 = vmatpush3.bf16.xpose.msra.mxu0 %v566_v6  ;;  %v2419_v14 = vld [vmem:[%s3559_s2 + $0x18] ss:$12 sps:$4 sm:$0xff]   ;;  %v94_v17 = vld [vmem:[%s3560_s3 + $0xb0] sm:$0xff]  ;;  %v101_v21 = vld [vmem:[%s3560_s3 + $0xe8] sm:$0xff] }
   0x6   :  { %278 = vperm.xlu0 %2416, %v103_v7   ;;  %v95_v18 = vld [vmem:[%s3560_s3 + $0xb8] sm:$0xff]  ;;  %v100_v20 = vld [vmem:[%s3560_s3 + $0xe0] sm:$0xff]  ;;  %v2421_v24 = vld [vmem:[%s3559_s2 + $0x48] ss:$12 sps:$4 sm:$0xff]  }
   0x7   :  { %308 = vperm.xlu1 %2417, %v109_v8   ;;  %v2420_v19 = vld [vmem:[%s3559_s2 + $0x30] ss:$12 sps:$4 sm:$0xff]   ;;  %v108_v23 = vld [vmem:[%s3560_s3 + $0x120] sm:$0xff]  ;;  %v85_v26 = vld [vmem:[%s3560_s3 + $0x68] sm:$0xff] }
   0x8   :  { %v107_v22 = vld [vmem:[%s3560_s3 + $0x118] sm:$0xff]  ;;  %v84_v25 = vld [vmem:[%s3560_s3 + $0x60] sm:$0xff]  ;;  %v98_v30 = vld [vmem:[%s3560_s3 + $0xd0] sm:$0xff] }
   0x9   :  { %v91_v27 = vld [vmem:[%s3560_s3 + $0x98] sm:$0xff]  ;;  %v92_v28 = vld [vmem:[%s3560_s3 + $0xa0] sm:$0xff]  ;;  %v105_v32 = vld [vmem:[%s3560_s3 + $0x108] sm:$0xff] }
   0xa   :  { %313 = vperm.xlu0 %2416, %v110_v10   ;;  %v2422_v29 = vld [vmem:[%s3559_s2 + $0x60] ss:$12 sps:$4 sm:$0xff]   ;;  %v99_v31 = vld [vmem:[%s3560_s3 + $0xd8] sm:$0xff]  ;;  %v106_v33 = vld [vmem:[%s3560_s3 + $0x110] sm:$0xff] }
   0xb   :  { %318 = vperm.xlu1 %2417, %v111_v11   ;;  %v2423_v34 = vld [vmem:[%s3559_s2 + $0x78] ss:$12 sps:$4 sm:$0xff]   ;;  %v82_v35 = vld [vmem:[%s3560_s3 + $0x50] sm:$0xff]  ;;  %v89_v37 = vld [vmem:[%s3560_s3 + $0x88] sm:$0xff] }
   0xc   :  { %2248 = vmatmul.mubr.msk.bf16.vlgmr.msra.gmra.mxu0 %vm489_vm0, %v2418_v9  ;;  %v83_v36 = vld [vmem:[%s3560_s3 + $0x58] sm:$0xff]  ;;  %v90_v38 = vld [vmem:[%s3560_s3 + $0x90] sm:$0xff]  ;;  %v96_v40 = vld [vmem:[%s3560_s3 + $0xc0] sm:$0xff] }
   0xd   :  { %2251 = vmatprep.mubr.msk.bf16.mxu0 %vm2533_vm1, %v2531_v2  ;;  %v2424_v39 = vld [vmem:[%s3559_s2 + $0x90] ss:$12 sps:$4 sm:$0xff]   ;;  %v97_v41 = vld [vmem:[%s3560_s3 + $0xc8] sm:$0xff]  ;;  %v80_v42 = vld [vmem:[%s3560_s3 + $0x40] sm:$0xff] }
   0xe   :  { %193 = vperm.xlu0 %2416, %v86_v12   ;;  %v81_v43 = vld [vmem:[%s3560_s3 + $0x48] sm:$0xff]  ;;  %v78_v45 = vld [vmem:[%s3560_s3 + $0x30] sm:$0xff]  ;;  %v79_v46 = vld [vmem:[%s3560_s3 + $0x38] sm:$0xff] }
   0xf   :  { %198 = vperm.xlu1 %2417, %v87_v13   ;;  %v2425_v44 = vld [vmem:[%s3559_s2 + $0xa8] ss:$12 sps:$4 sm:$0xff]   ;;  %v76_v47 = vld [vmem:[%s3560_s3 + $0x20] sm:$0xff]  ;;  %v75_v51 = vld [vmem:[%s3560_s3 + $0x18] sm:$0xff] }
  0x10   :  { %v77_v48 = vld [vmem:[%s3560_s3 + $0x28] sm:$0xff]  ;;  %v74_v50 = vld [vmem:[%s3560_s3 + $0x10] sm:$0xff] }
  0x11   :  { %v2426_v49 = vld [vmem:[%s3559_s2 + $0xc0] ss:$12 sps:$4 sm:$0xff]  }
  0x12   :  { %203 = vperm.xlu0 %2416, %v88_v15  }
  0x13   :  { %228 = vperm.xlu1 %2417, %v93_v16  }
  0x14   :  { %2252 = vmatmul.mubr.msk.bf16.gmra.mxu0 %vm489_vm0, %v2419_v14 }
  0x15   :  { %2255 = vmatprep.mubr.msk.bf16.mxu0 %vm2533_vm1, %v2531_v2 }
  0x16   :  { %233 = vperm.xlu0 %2416, %v94_v17  }
  0x17   :  { %238 = vperm.xlu1 %2417, %v95_v18  }
  0x1a   :  { %263 = vperm.xlu0 %2416, %v100_v20  }
  0x1b   :  { %268 = vperm.xlu1 %2417, %v101_v21  }
  0x1c   :  { %2256 = vmatmul.mubr.msk.bf16.gmra.mxu0 %vm489_vm0, %v2420_v19 }
  0x1d   :  { %2259 = vmatprep.mubr.msk.bf16.mxu0 %vm2533_vm1, %v2531_v2 }
  0x1e   :  { %298 = vperm.xlu0 %2416, %v107_v22  }
  0x1f   :  { %303 = vperm.xlu1 %2417, %v108_v23  }
  0x22   :  { %183 = vperm.xlu0 %2416, %v84_v25  }
  0x23   :  { %188 = vperm.xlu1 %2417, %v85_v26  }
  0x24   :  { %2260 = vmatmul.mubr.msk.bf16.gmra.mxu0 %vm489_vm0, %v2421_v24 }
  0x25   :  { %2263 = vmatprep.mubr.msk.bf16.mxu0 %vm2533_vm1, %v2531_v2 }
  0x26   :  { %218 = vperm.xlu0 %2416, %v91_v27  }
  0x27   :  { %223 = vperm.xlu1 %2417, %v92_v28  }
  0x2a   :  { %253 = vperm.xlu0 %2416, %v98_v30  }
  0x2b   :  { %258 = vperm.xlu1 %2417, %v99_v31  }
  0x2c   :  { %2264 = vmatmul.mubr.msk.bf16.gmra.mxu0 %vm489_vm0, %v2422_v29 }
  0x2d   :  { %2267 = vmatprep.mubr.msk.bf16.mxu0 %vm2533_vm1, %v2531_v2 }
  0x2e   :  { %288 = vperm.xlu0 %2416, %v105_v32  }
  0x2f   :  { %293 = vperm.xlu1 %2417, %v106_v33  }
  0x32   :  { %173 = vperm.xlu0 %2416, %v82_v35  }
  0x33   :  { %178 = vperm.xlu1 %2417, %v83_v36  }
  0x34   :  { %2268 = vmatmul.mubr.msk.bf16.gmra.mxu0 %vm489_vm0, %v2423_v34 }
  0x35   :  { %2271 = vmatprep.mubr.msk.bf16.mxu0 %vm2533_vm1, %v2531_v2 }
  0x36   :  { %208 = vperm.xlu0 %2416, %v89_v37  }
  0x37   :  { %213 = vperm.xlu1 %2417, %v90_v38  }
  0x3a   :  { %243 = vperm.xlu0 %2416, %v96_v40  }
  0x3b   :  { %248 = vperm.xlu1 %2417, %v97_v41  }
  0x3c   :  { %2272 = vmatmul.mubr.msk.bf16.gmra.mxu0 %vm489_vm0, %v2424_v39 }
  0x3d   :  { %2275 = vmatprep.mubr.msk.bf16.mxu0 %vm2533_vm1, %v2531_v2 }
  0x3e   :  { %163 = vperm.xlu0 %2416, %v80_v42  }
  0x3f   :  { %168 = vperm.xlu1 %2417, %v81_v43  }
  0x42   :  { %153 = vperm.xlu0 %2416, %v78_v45  }
  0x43   :  { %158 = vperm.xlu1 %2417, %v79_v46  }
  0x44   :  { %2276 = vmatmul.mubr.msk.bf16.gmra.mxu0 %vm489_vm0, %v2425_v44 }
  0x45   :  { %2279 = vmatprep.mubr.msk.bf16.mxu0 %vm2533_vm1, %v2531_v2 }
  0x46   :  { %143 = vperm.xlu0 %2416, %v76_v47  }
  0x47   :  { %148 = vperm.xlu1 %2417, %v77_v48  }
  0x4a   :  { %133 = vperm.xlu0 %2416, %v74_v50  }
  0x4b   :  { %9 = vsyncpa [#allocation3], 0  ;;  %138 = vperm.xlu1 %2417, %v75_v51   ;;  %v72_v52 = vld [vmem:[%s3560_s3] sm:$0xff]  ;;  %v73_v53 = vld [vmem:[%s3560_s3 + $0x8] sm:$0xff]  ;;  %vm1455_vm2 = vcmask 1043456   ;;  %vm1406_vm3 = vcmask 588800  }
  0x4c   :  { %2280 = vmatmul.mubr.msk.bf16.gmra.mxu0 %vm489_vm0, %v2426_v49  ;;  %v2427_v54 = vld [vmem:[%s3559_s2 + $0xd8] ss:$12 sps:$4 sm:$0xff]   ;;  %v113_v56 = vld [vmem:[%s3560_s3 + $0x148] sm:$0xff]  ;;  %v2428_v59 = vld [vmem:[%s3559_s2 + $0xf0] ss:$12 sps:$4 sm:$0xff]   ;;  %vm1846_vm4 = vcmask 39936  }
  0x4d   :  { %2283 = vmatprep.mubr.msk.bf16.mxu0 %vm2533_vm1, %v2531_v2  ;;  %v112_v55 = vld [vmem:[%s3560_s3 + $0x140] sm:$0xff]  ;;  %v119_v57 = vld [vmem:[%s3560_s3 + $0x178] sm:$0xff]  ;;  %v117_v60 = vld [vmem:[%s3560_s3 + $0x168] sm:$0xff]  ;;  %vm1899_vm5 = vcmask 392192   ;;  %vm1950_vm6 = vcmask 8192  }
  0x4e   :  { %123 = vperm.xlu0 %2416, %v72_v52   ;;  %v120_v58 = vld [vmem:[%s3560_s3 + $0x180] sm:$0xff]  ;;  %v118_v61 = vld [vmem:[%s3560_s3 + $0x170] sm:$0xff]  ;;  %v115_v62 = vld [vmem:[%s3560_s3 + $0x158] sm:$0xff] }
  0x4f   :  { %128 = vperm.xlu1 %2417, %v73_v53   ;;  %v116_v63 = vld [vmem:[%s3560_s3 + $0x160] sm:$0xff]  ;;  %v2429_v0 = vld [vmem:[%s3559_s2 + $0x108] ss:$12 sps:$4 sm:$0xff]   ;;  %v988_v4 = vld [vmem:[%s3560_s3 + $0x1f8] sm:$0xff] }
  0x50   :  { %v114_v1 = vld [vmem:[%s3560_s3 + $0x150] sm:$0xff]  ;;  %v989_v5 = vld [vmem:[%s3560_s3 + $0x200] sm:$0xff]  ;;  %v990_v6 = vld [vmem:[%s3560_s3 + $0x208] sm:$0xff] }
  0x51   :  { %v2430_v7 = vld [vmem:[%s3559_s2 + $0x120] ss:$12 sps:$4 sm:$0xff]   ;;  %v991_v8 = vld [vmem:[%s3560_s3 + $0x210] sm:$0xff]  ;;  %v996_v9 = vld [vmem:[%s3560_s3 + $0x238] sm:$0xff] }
  0x52   :  { %323 = vperm.xlu0 %2416, %v112_v55   ;;  %v997_v10 = vld [vmem:[%s3560_s3 + $0x240] sm:$0xff]  ;;  %v998_v11 = vld [vmem:[%s3560_s3 + $0x248] sm:$0xff]  ;;  %v999_v13 = vld [vmem:[%s3560_s3 + $0x250] sm:$0xff] }
  0x53   :  { %328 = vperm.xlu1 %2417, %v113_v56   ;;  %v2431_v12 = vld [vmem:[%s3559_s2 + $0x138] ss:$12 sps:$4 sm:$0xff]   ;;  %v986_v14 = vld [vmem:[%s3560_s3 + $0x1e8] sm:$0xff]  ;;  %v987_v15 = vld [vmem:[%s3560_s3 + $0x1f0] sm:$0xff] }
  0x54   :  { %2284 = vmatmul.mubr.msk.bf16.gmra.mxu0 %vm489_vm0, %v2427_v54  ;;  %v994_v16 = vld [vmem:[%s3560_s3 + $0x228] sm:$0xff]  ;;  %v2432_v17 = vld [vmem:[%s3559_s2 + $0x150] ss:$12 sps:$4 sm:$0xff]   ;;  %v985_v20 = vld [vmem:[%s3560_s3 + $0x1e0] sm:$0xff] }
  0x55   :  { %2287 = vmatprep.mubr.msk.bf16.mxu0 %vm2533_vm1, %v2531_v2  ;;  %v995_v18 = vld [vmem:[%s3560_s3 + $0x230] sm:$0xff]  ;;  %v984_v19 = vld [vmem:[%s3560_s3 + $0x1d8] sm:$0xff]  ;;  %v993_v25 = vld [vmem:[%s3560_s3 + $0x220] sm:$0xff] }
  0x56   :  { %358 = vperm.xlu0 %2416, %v119_v57   ;;  %v992_v21 = vld [vmem:[%s3560_s3 + $0x218] sm:$0xff]  ;;  %v2433_v24 = vld [vmem:[%s3559_s2 + $0x168] ss:$12 sps:$4 sm:$0xff]   ;;  %v2434_v33 = vld [vmem:[%s3559_s2 + $0x180] ss:$12 sps:$4 sm:$0xff]  }
  0x57   :  { %363 = vperm.xlu1 %2417, %v120_v58   ;;  %v982_v26 = vld [vmem:[%s3560_s3 + $0x1c8] sm:$0xff]  ;;  %v983_v29 = vld [vmem:[%s3560_s3 + $0x1d0] sm:$0xff]  ;;  %v980_v30 = vld [vmem:[%s3560_s3 + $0x1b8] sm:$0xff] }
  0x58   :  { %v981_v34 = vld [vmem:[%s3560_s3 + $0x1c0] sm:$0xff]  ;;  %v978_v35 = vld [vmem:[%s3560_s3 + $0x1a8] sm:$0xff]  ;;  %v979_v38 = vld [vmem:[%s3560_s3 + $0x1b0] sm:$0xff] }
  0x59   :  { %v976_v39 = vld [vmem:[%s3560_s3 + $0x198] sm:$0xff]  ;;  %v977_v43 = vld [vmem:[%s3560_s3 + $0x1a0] sm:$0xff]  ;;  %v974_v44 = vld [vmem:[%s3560_s3 + $0x188] sm:$0xff] }
  0x5a   :  { %348 = vperm.xlu0 %2416, %v117_v60   ;;  %v2435_v42 = vld [vmem:[%s3559_s2 + $0x198] ss:$12 sps:$4 sm:$0xff]   ;;  %v975_v47 = vld [vmem:[%s3560_s3 + $0x190] sm:$0xff]  ;;  %v1002_v48 = vld [vmem:[%s3560_s3 + $0x268] sm:$0xff] }
  0x5b   :  { %353 = vperm.xlu1 %2417, %v118_v61   ;;  %v2436_v51 = vld [vmem:[%s3559_s2 + $0x1b0] ss:$12 sps:$4 sm:$0xff]   ;;  %v1005_v56 = vld [vmem:[%s3560_s3 + $0x280] sm:$0xff]  ;;  %v2437_v60 = vld [vmem:[%s3559_s2 + $0x1c8] ss:$12 sps:$4 sm:$0xff]  }
  0x5c   :  { %2288 = vmatmul.mubr.msk.bf16.gmra.mxu0 %vm489_vm0, %v2428_v59  ;;  %v1003_v52 = vld [vmem:[%s3560_s3 + $0x270] sm:$0xff]  ;;  %v1004_v53 = vld [vmem:[%s3560_s3 + $0x278] sm:$0xff]  ;;  %v1001_v61 = vld [vmem:[%s3560_s3 + $0x260] sm:$0xff] }
  0x5d   :  { %2291 = vmatprep.mubr.msk.bf16.mxu0 %vm2533_vm1, %v2531_v2  ;;  %v1000_v57 = vld [vmem:[%s3560_s3 + $0x258] sm:$0xff] }
  0x5e   :  { %338 = vperm.xlu0 %2416, %v115_v62   ;;  %v1943_v62 = vld [vmem:[%s3560_s3 + $0x288] sm:$0x1] }
  0x5f   :  { %343 = vperm.xlu1 %2417, %v116_v63  }
  0x62   :  { %333 = vperm.xlu0 %2416, %v114_v1  }
  0x63   :  { %1078 = vperm.xlu1 %2417, %v988_v4  }
  0x64   :  { %2292 = vmatmul.mubr.msk.bf16.gmra.mxu0 %vm489_vm0, %v2429_v0 }
  0x65   :  { %2295 = vmatprep.mubr.msk.bf16.mxu0 %vm2533_vm1, %v2531_v2 }
  0x66   :  { %1083 = vperm.xlu0 %2416, %v989_v5   ;;  %v2438_v5 = vld [vmem:[%s3559_s2 + $0x1e0] ss:$12 sps:$4 sm:$0xff]  }
  0x67   :  { %1088 = vperm.xlu1 %2417, %v990_v6  }
  0x6a   :  { %1093 = vperm.xlu0 %2416, %v991_v8  }
  0x6b   :  { %1118 = vperm.xlu1 %2417, %v996_v9  }
  0x6c   :  { %2296 = vmatmul.mubr.msk.bf16.gmra.mxu0 %vm489_vm0, %v2430_v7 }
  0x6d   :  { %2299 = vmatprep.mubr.msk.bf16.mxu0 %vm2533_vm1, %v2531_v2 }
  0x6e   :  { %1123 = vperm.xlu0 %2416, %v997_v10   ;;  %v2439_v10 = vld [vmem:[%s3559_s2 + $0x1f8] ss:$12 sps:$4 sm:$0xff]  }
  0x6f   :  { %1128 = vperm.xlu1 %2417, %v998_v11  }
  0x72   :  { %1133 = vperm.xlu0 %2416, %v999_v13  }
  0x73   :  { %1068 = vperm.xlu1 %2417, %v986_v14  }
  0x74   :  { %2300 = vmatmul.mubr.msk.bf16.gmra.mxu0 %vm489_vm0, %v2431_v12 }
  0x75   :  { %2303 = vmatprep.mubr.msk.bf16.mxu0 %vm2533_vm1, %v2531_v2 }
  0x76   :  { %1073 = vperm.xlu0 %2416, %v987_v15   ;;  %v2440_v15 = vld [vmem:[%s3559_s2 + $0x210] ss:$12 sps:$4 sm:$0xff]  }
  0x77   :  { %1108 = vperm.xlu1 %2417, %v994_v16  }
  0x7a   :  { %1113 = vperm.xlu0 %2416, %v995_v18  }
  0x7b   :  { %1058 = vperm.xlu1 %2417, %v984_v19  }
  0x7c   :  { %2304 = vmatmul.mubr.msk.bf16.gmra.mxu0 %vm489_vm0, %v2432_v17 }
  0x7d   :  { %2307 = vmatprep.mubr.msk.bf16.mxu0 %vm2533_vm1, %v2531_v2  ;;  %v2851_v22 = vpop.permute.xlu0 %273 }
  0x7e   :  { %v2853_v23 = vpop.permute.xlu1 %283  ;;  %1063 = vperm.xlu0 %2416, %v985_v20   ;;  %v2441_v20 = vld [vmem:[%s3559_s2 + $0x228] ss:$12 sps:$4 sm:$0xff]  }
  0x7f   :  { %1098 = vperm.xlu1 %2417, %v992_v21  }
  0x81   :  { %v2864_v27 = vpop.permute.xlu0 %278 }
  0x82   :  { %v2866_v28 = vpop.permute.xlu1 %308  ;;  %1103 = vperm.xlu0 %2416, %v993_v25  }
  0x83   :  { %1048 = vperm.xlu1 %2417, %v982_v26  }
  0x84   :  { %2308 = vmatmul.mubr.msk.bf16.gmra.mxu0 %vm489_vm0, %v2433_v24 }
  0x85   :  { %2311 = vmatprep.mubr.msk.bf16.mxu0 %vm2533_vm1, %v2531_v2  ;;  %v2877_v31 = vpop.permute.xlu0 %313 }
  0x86   :  { %v2879_v32 = vpop.permute.xlu1 %318  ;;  %1053 = vperm.xlu0 %2416, %v983_v29   ;;  %v2442_v29 = vld [vmem:[%s3559_s2 + $0x240] ss:$0 sps:$4 sm:$0xff]  }
  0x87   :  { %1038 = vperm.xlu1 %2417, %v980_v30  }
  0x89   :  { %v2890_v36 = vpop.permute.xlu0 %193 }
  0x8a   :  { %v2892_v37 = vpop.permute.xlu1 %198  ;;  %1043 = vperm.xlu0 %2416, %v981_v34  }
  0x8b   :  { %1028 = vperm.xlu1 %2417, %v978_v35  }
  0x8c   :  { %2312 = vmatmul.mubr.msk.bf16.gmra.mxu0 %vm489_vm0, %v2434_v33 }
  0x8d   :  { %2315 = vmatprep.mubr.msk.bf16.mxu0 %vm2533_vm1, %v2531_v2  ;;  %v2903_v40 = vpop.permute.xlu0 %203 }
  0x8e   :  { %v2905_v41 = vpop.permute.xlu1 %228  ;;  %1033 = vperm.xlu0 %2416, %v979_v38  }
  0x8f   :  { %1018 = vperm.xlu1 %2417, %v976_v39  }
  0x91   :  { %v2916_v45 = vpop.permute.xlu0 %233 }
  0x92   :  { %v2918_v46 = vpop.permute.xlu1 %238  ;;  %1023 = vperm.xlu0 %2416, %v977_v43  }
  0x93   :  { %1008 = vperm.xlu1 %2417, %v974_v44  }
  0x94   :  { %2316 = vmatmul.mubr.msk.bf16.gmra.mxu0 %vm489_vm0, %v2435_v42 }
  0x95   :  { %2319 = vmatprep.mubr.msk.bf16.mxu0 %vm2533_vm1, %v2531_v2  ;;  %v2929_v49 = vpop.permute.xlu0 %263 }
  0x96   :  { %v2931_v50 = vpop.permute.xlu1 %268  ;;  %1013 = vperm.xlu0 %2416, %v975_v47  }
  0x97   :  { %1148 = vperm.xlu1 %2417, %v1002_v48  }
  0x99   :  { %v2942_v54 = vpop.permute.xlu0 %298 }
  0x9a   :  { %v2944_v55 = vpop.permute.xlu1 %303  ;;  %1153 = vperm.xlu0 %2416, %v1003_v52  }
  0x9b   :  { %1158 = vperm.xlu1 %2417, %v1004_v53  }
  0x9c   :  { %2320 = vmatmul.mubr.msk.bf16.gmra.mxu0 %vm489_vm0, %v2436_v51 }
  0x9d   :  { %2323 = vmatprep.mubr.msk.bf16.mxu0 %vm2533_vm1, %v2531_v2  ;;  %v2955_v58 = vpop.permute.xlu0 %183 }
  0x9e   :  { %v2957_v59 = vpop.permute.xlu1 %188  ;;  %1163 = vperm.xlu0 %2416, %v1005_v56  }
  0x9f   :  { %1138 = vperm.xlu1 %2417, %v1000_v57  }
  0xa1   :  { %v2968_v63 = vpop.permute.xlu0 %218 }
  0xa2   :  { %v2970_v0 = vpop.permute.xlu1 %223  ;;  %1143 = vperm.xlu0 %2416, %v1001_v61  }
  0xa3   :  { %1946 = vperm.xlu1 %2417, %v1943_v62  }
  0xa4   :  { %2324 = vmatmul.mubr.msk.bf16.gmra.mxu0 %vm489_vm0, %v2437_v60 }
  0xa5   :  { %2327 = vmatprep.mubr.msk.bf16.mxu0 %vm2533_vm1, %v2531_v2  ;;  %v2975_v1 = vpop.permute.xlu0 %253 }
  0xa6   :  { %v2977_v4 = vpop.permute.xlu1 %258 }
  0xa9   :  { %v2982_v6 = vpop.permute.xlu0 %288 }
  0xaa   :  { %v2984_v7 = vpop.permute.xlu1 %293 }
  0xac   :  { %2328 = vmatmul.mubr.msk.bf16.gmra.mxu0 %vm489_vm0, %v2438_v5 }
  0xad   :  { %2331 = vmatprep.mubr.msk.bf16.mxu0 %vm2533_vm1, %v2531_v2  ;;  %v2989_v8 = vpop.permute.xlu0 %173 }
  0xae   :  { %v2991_v9 = vpop.permute.xlu1 %178 }
  0xb1   :  { %v2996_v11 = vpop.permute.xlu0 %208 }
  0xb2   :  { %v2998_v12 = vpop.permute.xlu1 %213 }
  0xb4   :  { %2332 = vmatmul.mubr.msk.bf16.gmra.mxu0 %vm489_vm0, %v2439_v10 }
  0xb5   :  { %2335 = vmatprep.mubr.msk.bf16.mxu0 %vm2533_vm1, %v2531_v2  ;;  %v3003_v13 = vpop.permute.xlu0 %243 }
  0xb6   :  { %v3005_v14 = vpop.permute.xlu1 %248 }
  0xb9   :  { %v164_v16 = vpop.permute.xlu0 %163 }
  0xba   :  { %v169_v17 = vpop.permute.xlu1 %168 }
  0xbc   :  { %2336 = vmatmul.mubr.msk.bf16.gmra.mxu0 %vm489_vm0, %v2440_v15 }
  0xbd   :  { %2339 = vmatprep.mubr.msk.bf16.mxu0 %vm2533_vm1, %v2531_v2  ;;  %v154_v18 = vpop.permute.xlu0 %153 }
  0xbe   :  { %v159_v19 = vpop.permute.xlu1 %158 }
  0xc1   :  { %v144_v21 = vpop.permute.xlu0 %143 }
  0xc2   :  { %v149_v24 = vpop.permute.xlu1 %148 }
  0xc4   :  { %2340 = vmatmul.mubr.msk.bf16.gmra.mxu0 %vm489_vm0, %v2441_v20 }
  0xc5   :  { %2343 = vmatprep.mubr.msk.bf16.mxu0 %vm2533_vm1, %v2531_v2  ;;  %v134_v25 = vpop.permute.xlu0 %133 }
  0xc6   :  { %v139_v26 = vpop.permute.xlu1 %138 }
  0xc9   :  { %v124_v33 = vpop.permute.xlu0 %123 }
  0xca   :  { %v129_v35 = vpop.permute.xlu1 %128 }
  0xcc   :  { %v602_v30 = vpop.f32.mrf.mxu0  ;;  %2344 = vmatmul.mubr.msk.bf16.gmra.mxu0 %vm489_vm0, %v2442_v29 }
  0xcd   :  { %v603_v39 = vadd.f32 %v602_v30, %v124_v33 }
  0xce   :  { %v2249_v34 = vpop.f32.mrf.mxu0 }
  0xd0   :  { %v605_v38 = vpop.f32.mrf.mxu0 }
  0xd1   :  { %v606_v42 = vadd.f32 %v605_v38, %v129_v35 }
  0xd2   :  { %v2250_v43 = vpop.f32.mrf.mxu0 }
  0xd3   :  { %v800_v44 = vmax.f32 %v603_v39, %v606_v42 }
  0xd4   :  { %v610_v47 = vpop.f32.mrf.mxu0 }
  0xd5   :  { %v611_v48 = vadd.f32 %v610_v47, %v134_v25 }
  0xd6   :  { %v2253_v51 = vpop.f32.mrf.mxu0 }
  0xd7   :  { %v801_v52 = vmax.f32 %v606_v42, %v611_v48 }
  0xd8   :  { %v613_v53 = vpop.f32.mrf.mxu0 }
  0xd9   :  { %v614_v56 = vadd.f32 %v613_v53, %v139_v26 }
  0xda   :  { %v2254_v57 = vpop.f32.mrf.mxu0 }
  0xdb   :  { %v802_v60 = vmax.f32 %v611_v48, %v614_v56 }
  0xdc   :  { %v618_v61 = vpop.f32.mrf.mxu0 }
  0xdd   :  { %v619_v62 = vadd.f32 %v618_v61, %v144_v21 }
  0xde   :  { %v2257_v5 = vpop.f32.mrf.mxu0 }
  0xdf   :  { %v803_v10 = vmax.f32 %v614_v56, %v619_v62 }
  0xe0   :  { %v621_v15 = vpop.f32.mrf.mxu0 }
  0xe1   :  { %v622_v20 = vadd.f32 %v621_v15, %v149_v24 }
  0xe2   :  { %v2258_v29 = vpop.f32.mrf.mxu0 }
  0xe3   :  { %v804_v34 = vmax.f32 %v619_v62, %v622_v20 }
  0xe4   :  { %v626_v30 = vpop.f32.mrf.mxu0 }
  0xe5   :  { %v627_v33 = vadd.f32 %v626_v30, %v154_v18 }
  0xe6   :  { %v2261_v35 = vpop.f32.mrf.mxu0 }
  0xe7   :  { %v805_v38 = vmax.f32 %v622_v20, %v627_v33 }
  0xe8   :  { %v629_v39 = vpop.f32.mrf.mxu0 }
  0xe9   :  { %v630_v25 = vadd.f32 %v629_v39, %v159_v19 }
  0xea   :  { %v2262_v43 = vpop.f32.mrf.mxu0 }
  0xeb   :  { %v806_v42 = vmax.f32 %v627_v33, %v630_v25 }
  0xec   :  { %v634_v47 = vpop.f32.mrf.mxu0 }
  0xed   :  { %v635_v26 = vadd.f32 %v634_v47, %v164_v16 }
  0xee   :  { %v2265_v51 = vpop.f32.mrf.mxu0 }
  0xef   :  { %v807_v48 = vmax.f32 %v630_v25, %v635_v26 }
  0xf0   :  { %v637_v53 = vpop.f32.mrf.mxu0 }
  0xf1   :  { %v848_v21 = vmax.f32 %v800_v44, %v807_v48  ;;  %v638_v57 = vadd.f32 %v637_v53, %v169_v17 }
  0xf2   :  { %v2266_v56 = vpop.f32.mrf.mxu0 }
  0xf3   :  { %v808_v61 = vmax.f32 %v635_v26, %v638_v57 }
  0xf4   :  { %v642_v24 = vpop.f32.mrf.mxu0 }
  0xf5   :  { %v849_v5 = vmax.f32 %v801_v52, %v808_v61  ;;  %v643_v62 = vadd.f32 %v642_v24, %v2989_v8 }
  0xf6   :  { %v2269_v18 = vpop.f32.mrf.mxu0 }
  0xf7   :  { %v3024_v15 = vpack.c.bf16 %v849_v5, %v848_v21  ;;  %v809_v20 = vmax.f32 %v638_v57, %v643_v62 }
  0xf8   :  { %v645_v19 = vpop.f32.mrf.mxu0 }
  0xf9   :  { %v850_v29 = vmax.f32 %v802_v60, %v809_v20  ;;  %v646_v30 = vadd.f32 %v645_v19, %v2991_v9 }
  0xfa   :  { %v2270_v16 = vpop.f32.mrf.mxu0 }
  0xfb   :  { %v810_v33 = vmax.f32 %v643_v62, %v646_v30 }
  0xfc   :  { %v650_v35 = vpop.f32.mrf.mxu0 }
  0xfd   :  { %v851_v39 = vmax.f32 %v803_v10, %v810_v33  ;;  %v651_v17 = vadd.f32 %v650_v35, %v2955_v58 }
  0xfe   :  { %v2273_v44 = vpop.f32.mrf.mxu0 }
  0xff   :  { %v3028_v25 = vpack.c.bf16 %v851_v39, %v850_v29  ;;  %v811_v52 = vmax.f32 %v646_v30, %v651_v17 }
 0x100   :  { %v653_v43 = vpop.f32.mrf.mxu0 }
 0x101   :  { %v852_v8 = vmax.f32 %v804_v34, %v811_v52  ;;  %v654_v47 = vadd.f32 %v653_v43, %v2957_v59 }
 0x102   :  { %v2274_v26 = vpop.f32.mrf.mxu0 }
 0x103   :  { %v812_v51 = vmax.f32 %v651_v17, %v654_v47 }
 0x104   :  { %v658_v53 = vpop.f32.mrf.mxu0 }
 0x105   :  { %v853_v60 = vmax.f32 %v805_v38, %v812_v51  ;;  %v659_v9 = vadd.f32 %v658_v53, %v2890_v36  ;;  %v2445_v38 = vld [vmem:[%s3559_s2 + $0x250] ss:$12 sps:$4 sm:$0xff]   ;;  %v2448_v36 = vld [vmem:[%s3559_s2 + $0x268] ss:$12 sps:$4 sm:$0xff]  }
 0x106   :  { %v2277_v21 = vpop.f32.mrf.mxu0  ;;  %1491 = vmatprep.mubr.bf16.mxu0 %v2445_v38  ;;  %1499 = vmatprep.mubr.bf16.mxu1 %v2448_v36 }
 0x107   :  { %v3032_v57 = vpack.c.bf16 %v853_v60, %v852_v8  ;;  %v813_v10 = vmax.f32 %v654_v47, %v659_v9 }
 0x108   :  { %v661_v56 = vpop.f32.mrf.mxu0 }
 0x109   :  { %v854_v58 = vmax.f32 %v806_v42, %v813_v10  ;;  %v662_v24 = vadd.f32 %v661_v56, %v2892_v37 }
 0x10a   :  { %v2278_v5 = vpop.f32.mrf.mxu0 }
 0x10b   :  { %v814_v62 = vmax.f32 %v659_v9, %v662_v24 }
 0x10c   :  { %v666_v18 = vpop.f32.mrf.mxu0 }
 0x10d   :  { %v855_v34 = vmax.f32 %v807_v48, %v814_v62  ;;  %v667_v59 = vadd.f32 %v666_v18, %v2903_v40 }
 0x10e   :  { %v2281_v19 = vpop.f32.mrf.mxu0 }
 0x10f   :  { %v3042_v29 = vpack.c.bf16 %v855_v34, %v854_v58  ;;  %v815_v42 = vmax.f32 %v662_v24, %v667_v59 }
 0x110   :  { %v669_v30 = vpop.f32.mrf.mxu0 }
 0x111   :  { %v856_v37 = vmax.f32 %v808_v61, %v815_v42  ;;  %v670_v48 = vadd.f32 %v669_v30, %v2996_v11 }
 0x112   :  { %v2282_v16 = vpop.f32.mrf.mxu0 }
 0x113   :  { %v816_v40 = vmax.f32 %v667_v59, %v670_v48 }
 0x114   :  { %v674_v35 = vpop.f32.mrf.mxu0 }
 0x115   :  { %v857_v39 = vmax.f32 %v809_v20, %v816_v40  ;;  %v675_v17 = vadd.f32 %v674_v35, %v2998_v12 }
 0x116   :  { %v2285_v44 = vpop.f32.mrf.mxu0 }
 0x117   :  { %v3046_v43 = vpack.c.bf16 %v857_v39, %v856_v37  ;;  %v817_v8 = vmax.f32 %v670_v48, %v675_v17 }
 0x118   :  { %v677_v47 = vpop.f32.mrf.mxu0 }
 0x119   :  { %v858_v26 = vmax.f32 %v810_v33, %v817_v8  ;;  %v678_v53 = vadd.f32 %v677_v47, %v2968_v63 }
 0x11a   :  { %v2286_v60 = vpop.f32.mrf.mxu0 }
 0x11b   :  { %v818_v9 = vmax.f32 %v675_v17, %v678_v53 }
 0x11c   :  { %v682_v21 = vpop.f32.mrf.mxu0 }
 0x11d   :  { %v859_v61 = vmax.f32 %v811_v52, %v818_v9  ;;  %v683_v11 = vadd.f32 %v682_v21, %v2970_v0 }
 0x11e   :  { %v2289_v56 = vpop.f32.mrf.mxu0 }
 0x11f   :  { %v3050_v58 = vpack.c.bf16 %v859_v61, %v858_v26  ;;  %v819_v20 = vmax.f32 %v678_v53, %v683_v11 }
 0x120   :  { %v685_v24 = vpop.f32.mrf.mxu0 }
 0x121   :  { %v860_v12 = vmax.f32 %v812_v51, %v819_v20  ;;  %v686_v5 = vadd.f32 %v685_v24, %v2905_v41 }
 0x122   :  { %v2290_v18 = vpop.f32.mrf.mxu0 }
 0x123   :  { %v820_v34 = vmax.f32 %v683_v11, %v686_v5 }
 0x124   :  { %v690_v59 = vpop.f32.mrf.mxu0 }
 0x125   :  { %v861_v33 = vmax.f32 %v813_v10, %v820_v34  ;;  %v691_v63 = vadd.f32 %v690_v59, %v2916_v45 }
 0x126   :  { %v2293_v19 = vpop.f32.mrf.mxu0 }
 0x127   :  { %v3054_v38 = vpack.c.bf16 %v861_v33, %v860_v12  ;;  %v821_v52 = vmax.f32 %v686_v5, %v691_v63 }
 0x128   :  { %v693_v36 = vpop.f32.mrf.mxu0 }
 0x129   :  { %v862_v0 = vmax.f32 %v814_v62, %v821_v52  ;;  %v694_v30 = vadd.f32 %v693_v36, %v2918_v46 }
 0x12a   :  { %v2294_v37 = vpop.f32.mrf.mxu0 }
 0x12b   :  { %v822_v48 = vmax.f32 %v691_v63, %v694_v30 }
 0x12c   :  { %v698_v16 = vpop.f32.mrf.mxu0 }
 0x12d   :  { %v863_v51 = vmax.f32 %v815_v42, %v822_v48  ;;  %v699_v41 = vadd.f32 %v698_v16, %v3003_v13 }
 0x12e   :  { %v2297_v35 = vpop.f32.mrf.mxu0 }
 0x12f   :  { %v3058_v39 = vpack.c.bf16 %v863_v51, %v862_v0  ;;  %v823_v10 = vmax.f32 %v694_v30, %v699_v41 }
 0x130   :  { %v701_v17 = vpop.f32.mrf.mxu0 }
 0x131   :  { %v864_v45 = vmax.f32 %v816_v40, %v823_v10  ;;  %v702_v44 = vadd.f32 %v701_v17, %v3005_v14 }
 0x132   :  { %v2298_v47 = vpop.f32.mrf.mxu0 }
 0x133   :  { %v824_v26 = vmax.f32 %v699_v41, %v702_v44 }
 0x134   :  { %v706_v53 = vpop.f32.mrf.mxu0 }
 0x135   :  { %v865_v62 = vmax.f32 %v817_v8, %v824_v26  ;;  %v707_v46 = vadd.f32 %v706_v53, %v2975_v1 }
 0x136   :  { %v2301_v60 = vpop.f32.mrf.mxu0 }
 0x137   :  { %v825_v21 = vmax.f32 %v702_v44, %v707_v46  ;;  %v3062_v61 = vpack.c.bf16 %v865_v62, %v864_v45 }
 0x138   :  { %v709_v42 = vpop.f32.mrf.mxu0 }
 0x139   :  { %v866_v13 = vmax.f32 %v818_v9, %v825_v21  ;;  %v710_v11 = vadd.f32 %v709_v42, %v2977_v4 }
 0x13a   :  { %v2302_v56 = vpop.f32.mrf.mxu0 }
 0x13b   :  { %v3065_v24 = vmax.f32 %v707_v46, %v710_v11 }
 0x13c   :  { %v714_v40 = vpop.f32.mrf.mxu0 }
 0x13d   :  { %v867_v14 = vmax.f32 %v819_v20, %v3065_v24  ;;  %v715_v12 = vadd.f32 %v714_v40, %v2929_v49 }
 0x13e   :  { %v2305_v5 = vpop.f32.mrf.mxu0 }
 0x13f   :  { %v3069_v8 = vpack.c.bf16 %v867_v14, %v866_v13  ;;  %v3071_v18 = vmax.f32 %v710_v11, %v715_v12 }
 0x140   :  { %v717_v1 = vpop.f32.mrf.mxu0 }
 0x141   :  { %v718_v59 = vadd.f32 %v717_v1, %v2931_v50  ;;  %v868_v4 = vmax.f32 %v820_v34, %v3071_v18 }
 0x142   :  { %v2306_v33 = vpop.f32.mrf.mxu0 }
 0x143   :  { %v828_v9 = vmax.f32 %v715_v12, %v718_v59 }
 0x144   :  { %v722_v63 = vpop.f32.mrf.mxu0 }
 0x145   :  { %v869_v19 = vmax.f32 %v821_v52, %v828_v9  ;;  %v723_v36 = vadd.f32 %v722_v63, %v2851_v22 }
 0x146   :  { %v2309_v0 = vpop.f32.mrf.mxu0 }
 0x147   :  { %v3076_v20 = vpack.c.bf16 %v869_v19, %v868_v4  ;;  %v829_v30 = vmax.f32 %v718_v59, %v723_v36 }
 0x148   :  { %v725_v49 = vpop.f32.mrf.mxu0 }
 0x149   :  { %v726_v37 = vadd.f32 %v725_v49, %v2864_v27  ;;  %v870_v35 = vmax.f32 %v822_v48, %v829_v30 }
 0x14a   :  { %v2310_v16 = vpop.f32.mrf.mxu0 }
 0x14b   :  { %v830_v51 = vmax.f32 %v723_v36, %v726_v37 }
 0x14c   :  { %v730_v41 = vpop.f32.mrf.mxu0 }
 0x14d   :  { %v871_v50 = vmax.f32 %v823_v10, %v830_v51  ;;  %v731_v17 = vadd.f32 %v730_v41, %v2853_v23 }
 0x14e   :  { %v2313_v45 = vpop.f32.mrf.mxu0 }
 0x14f   :  { %v3080_v44 = vpack.c.bf16 %v871_v50, %v870_v35  ;;  %v831_v52 = vmax.f32 %v726_v37, %v731_v17  ;;  %v324_v45 = vpop.permute.xlu0 %323 }
 0x150   :  { %v733_v34 = vpop.f32.mrf.mxu0 }
 0x151   :  { %v734_v22 = vadd.f32 %v733_v34, %v2982_v6  ;;  %v872_v46 = vmax.f32 %v824_v26, %v831_v52 }
 0x152   :  { %v2314_v47 = vpop.f32.mrf.mxu0 }
 0x153   :  { %v3083_v53 = vmax.f32 %v731_v17, %v734_v22 }
 0x154   :  { %v738_v62 = vpop.f32.mrf.mxu0 }
 0x155   :  { %v873_v27 = vmax.f32 %v825_v21, %v3083_v53  ;;  %v739_v4 = vadd.f32 %v738_v62, %v2984_v7 }
 0x156   :  { %v2317_v60 = vpop.f32.mrf.mxu0 }
 0x157   :  { %v965_v42 = vpack.c.bf16 %v873_v27, %v872_v46 }
 0x158   :  { %v741_v48 = vpop.f32.mrf.mxu0 }
 0x159   :  { %v742_v26 = vadd.f32 %v741_v48, %v2942_v54 }
 0x15a   :  { %v2318_v10 = vpop.f32.mrf.mxu0 }
 0x15c   :  { %v746_v13 = vpop.f32.mrf.mxu0 }
 0x15d   :  { %v747_v5 = vadd.f32 %v746_v13, %v2944_v55  ;;  %v3103_v55 = vmax.f32 %v739_v4, %v742_v26 }
 0x15e   :  { %v2321_v23 = vpop.f32.mrf.mxu0 }
 0x15f   :  { %v3098_v19 = vmax.f32 %v742_v26, %v747_v5  ;;  %v875_v41 = vmax.f32 %v3071_v18, %v3103_v55 }
 0x160   :  { %v749_v11 = vpop.f32.mrf.mxu0 }
 0x161   :  { %v750_v14 = vadd.f32 %v749_v11, %v2866_v28  ;;  %v876_v37 = vmax.f32 %v828_v9, %v3098_v19  ;;  %v2443_v11 = vld [vmem:[%s3559_s2 + $0x24c] ss:$12 sps:$4 sm:$0xff]  }
 0x162   :  { %v2322_v56 = vpop.f32.mrf.mxu0 }
 0x163   :  { %v3090_v21 = vmax.f32 %v747_v5, %v750_v14  ;;  %v2446_v56 = vld [vmem:[%s3559_s2 + $0x264] ss:$12 sps:$4 sm:$0xff]  }
 0x164   :  { %v754_v40 = vpop.f32.mrf.mxu0 }
 0x165   :  { %v755_v6 = vadd.f32 %v754_v40, %v2877_v31  ;;  %v877_v54 = vmax.f32 %v829_v30, %v3090_v21 }
 0x166   :  { %v2325_v12 = vpop.f32.mrf.mxu0 }
 0x167   :  { %v3092_v59 = vmax.f32 %v750_v14, %v755_v6  ;;  %v967_v35 = vpack.c.bf16 %v877_v54, %v876_v37  ;;  %v2449_v14 = vld [vmem:[%s3559_s2 + $0x280] ss:$12 sps:$4 sm:$0xff]  }
 0x168   :  { %v757_v1 = vpop.f32.mrf.mxu0 }
 0x169   :  { %v3095_v33 = vadd.f32 %v757_v1, %v2879_v32  ;;  %v878_v36 = vmax.f32 %v830_v51, %v3092_v59  ;;  %v3108_v32 = vmax.f32 %v734_v22, %v739_v4 }
 0x16a   :  { %v2326_v63 = vpop.f32.mrf.mxu0 }
 0x16b   :  { %v3101_v28 = vmax.f32 %v755_v6, %v3095_v33  ;;  %v874_v30 = vmax.f32 %v3065_v24, %v3108_v32 }
 0x16c   :  { %v762_v31 = vpop.f32.mrf.mxu0 }
 0x16d   :  { %v879_v0 = vmax.f32 %v831_v52, %v3101_v28  ;;  %v966_v9 = vpack.c.bf16 %v875_v41, %v874_v30 }
 0x16e   :  { %v2329_v49 = vpop.f32.mrf.mxu0 }
 0x16f   :  { %v968_v7 = vpack.c.bf16 %v879_v0, %v878_v36 }
 0x170   :  { %v765_v16 = vpop.f32.mrf.mxu0 }
 0x171   :  { %2110 = vmatprep.subr.bf16.mxu0 %v968_v7  ;;  %2395 = vmatprep.subr.bf16.mxu1 %v968_v7 }
 0x172   :  { %v2330_v50 = vpop.f32.mrf.mxu0  ;;  %2111 = vmatpush3.bf16.msra.mxu0 %v3058_v39  ;;  %2403 = vmatpush3.bf16.msra.mxu1 %v3058_v39  ;;  %v329_v39 = vpop.permute.xlu1 %328 }
 0x173   :  { %2112 = vmatprep.subr.bf16.mxu0 %v967_v35  ;;  %2396 = vmatprep.subr.bf16.mxu1 %v967_v35  ;;  %v2451_v50 = vld [vmem:[%s3559_s2 + $0x27c] ss:$12 sps:$4 sm:$0xff]  }
 0x174   :  { %v3117_v51 = vpop.f32.mrf.mxu0 }
 0x176   :  { %v2333_v17 = vpop.f32.mrf.mxu0  ;;  %2113 = vmatpush3.bf16.msra.mxu0 %v3054_v38  ;;  %2404 = vmatpush3.bf16.msra.mxu1 %v3054_v38  ;;  %v359_v38 = vpop.permute.xlu0 %358 }
 0x177   :  { %2114 = vmatprep.subr.bf16.mxu0 %v966_v9  ;;  %2397 = vmatprep.subr.bf16.mxu1 %v966_v9  ;;  %v364_v47 = vpop.permute.xlu1 %363 }
 0x178   :  { %v773_v18 = vpop.f32.mrf.mxu0 }
 0x17a   :  { %v2334_v34 = vpop.f32.mrf.mxu0  ;;  %2115 = vmatpush3.bf16.msra.mxu0 %v3050_v58  ;;  %2405 = vmatpush3.bf16.msra.mxu1 %v3050_v58  ;;  %v349_v46 = vpop.permute.xlu0 %348 }
 0x17b   :  { %2116 = vmatprep.subr.bf16.mxu0 %v965_v42  ;;  %2398 = vmatprep.subr.bf16.mxu1 %v965_v42  ;;  %v763_v42 = vadd.f32 %v762_v31, %v324_v45  ;;  %v2454_v45 = vld [vmem:[%s3559_s2 + $0x294] ss:$12 sps:$4 sm:$0xff]  }
 0x17c   :  { %v778_v24 = vpop.f32.mrf.mxu0 }
 0x17d   :  { %v839_v40 = vmax.f32 %v3095_v33, %v763_v42 }
 0x17e   :  { %v2337_v52 = vpop.f32.mrf.mxu0  ;;  %2117 = vmatpush3.bf16.msra.mxu0 %v3046_v43  ;;  %2406 = vmatpush3.bf16.msra.mxu1 %v3046_v43  ;;  %v354_v43 = vpop.permute.xlu1 %353 }
 0x17f   :  { %2118 = vmatprep.subr.bf16.mxu0 %v3080_v44  ;;  %2399 = vmatprep.subr.bf16.mxu1 %v3080_v44  ;;  %v2464_v52 = vld [vmem:[%s3559_s2 + $0x2f8] ss:$12 sps:$4 sm:$0xff]  }
 0x180   :  { %v781_v22 = vpop.f32.mrf.mxu0 }
 0x181   :  { %v782_v13 = vadd.f32 %v781_v22, %v349_v46  ;;  %v2467_v22 = vld [vmem:[%s3559_s2 + $0x310] ss:$12 sps:$4 sm:$0xff]   ;;  %v2473_v46 = vld [vmem:[%s3559_s2 + $0x340] ss:$12 sps:$4 sm:$0xff]  }
 0x182   :  { %v2338_v62 = vpop.f32.mrf.mxu0  ;;  %2119 = vmatpush3.bf16.msra.mxu0 %v3042_v29  ;;  %2407 = vmatpush3.bf16.msra.mxu1 %v3042_v29 }
 0x183   :  { %2120 = vmatprep.subr.bf16.mxu0 %v3076_v20  ;;  %2400 = vmatprep.subr.bf16.mxu1 %v3076_v20  ;;  %v766_v20 = vadd.f32 %v765_v16, %v329_v39  ;;  %v2461_v39 = vld [vmem:[%s3559_s2 + $0x2e0] ss:$12 sps:$4 sm:$0xff]   ;;  %v2470_v62 = vld [vmem:[%s3559_s2 + $0x328] ss:$12 sps:$4 sm:$0xff]  }
 0x184   :  { %v786_v58 = vpop.f32.mrf.mxu0 }
 0x185   :  { %v787_v48 = vadd.f32 %v786_v58, %v354_v43  ;;  %v840_v6 = vmax.f32 %v763_v42, %v766_v20  ;;  %v2472_v58 = vld [vmem:[%s3559_s2 + $0x324] ss:$12 sps:$4 sm:$0xff]   ;;  %v2481_v42 = vld [vmem:[%s3559_s2 + $0x36c] ss:$12 sps:$4 sm:$0xff]  }
 0x186   :  { %v2341_v27 = vpop.f32.mrf.mxu0  ;;  %2121 = vmatpush3.bf16.msra.mxu0 %v3032_v57  ;;  %2408 = vmatpush3.bf16.msra.mxu1 %v3032_v57  ;;  %v339_v57 = vpop.permute.xlu0 %338  ;;  %v2476_v43 = vld [vmem:[%s3559_s2 + $0x358] ss:$12 sps:$4 sm:$0xff]  }
 0x187   :  { %2122 = vmatprep.subr.bf16.mxu0 %v3069_v8  ;;  %2401 = vmatprep.subr.bf16.mxu1 %v3069_v8  ;;  %v845_v5 = vmax.f32 %v782_v13, %v787_v48  ;;  %v774_v26 = vadd.f32 %v773_v18, %v339_v57  ;;  %v881_v17 = vmax.f32 %v3108_v32, %v840_v6  ;;  %v2458_v32 = vld [vmem:[%s3559_s2 + $0x2c8] ss:$12 sps:$4 sm:$0xff]  }
 0x188   :  { %v789_v44 = vpop.f32.mrf.mxu0  ;;  %v2475_v27 = vld [vmem:[%s3559_s2 + $0x33c] ss:$12 sps:$4 sm:$0xff]  }
 0x189   :  { %v790_v60 = vadd.f32 %v789_v44, %v359_v38  ;;  %v886_v49 = vmax.f32 %v3101_v28, %v845_v5  ;;  %v2466_v38 = vld [vmem:[%s3559_s2 + $0x2f4] ss:$12 sps:$4 sm:$0xff]   ;;  %v2487_v57 = vld [vmem:[%s3559_s2 + $0x39c] ss:$12 sps:$4 sm:$0xff]   ;;  %v2501_v5 = vld [vmem:[%s3559_s2 + $0x344] ss:$12 sps:$4 sm:$0xff]  }
 0x18a   :  { %v2342_v29 = vpop.f32.mrf.mxu0  ;;  %2123 = vmatpush3.bf16.msra.mxu0 %v3028_v25  ;;  %2409 = vmatpush3.bf16.msra.mxu1 %v3028_v25  ;;  %v344_v25 = vpop.permute.xlu1 %343  ;;  %v2478_v44 = vld [vmem:[%s3559_s2 + $0x354] ss:$12 sps:$4 sm:$0xff]  }
 0x18b   :  { %2124 = vmatprep.subr.bf16.mxu0 %v3062_v61  ;;  %2402 = vmatprep.subr.bf16.mxu1 %v3062_v61  ;;  %v846_v23 = vmax.f32 %v787_v48, %v790_v60  ;;  %v779_v12 = vadd.f32 %v778_v24, %v344_v25  ;;  %v334_v54 = vpop.permute.xlu0 %333  ;;  %v2463_v24 = vld [vmem:[%s3559_s2 + $0x2dc] ss:$12 sps:$4 sm:$0xff]   ;;  %v2485_v48 = vld [vmem:[%s3559_s2 + $0x3a0] ss:$12 sps:$4 sm:$0xff]  }
 0x18c   :  { %v794_v10 = vpop.f32.mrf.mxu0  ;;  %v771_v36 = vadd.f32 %v3117_v51, %v334_v54  ;;  %v2482_v29 = vld [vmem:[%s3559_s2 + $0x388] ss:$12 sps:$4 sm:$0xff]  }
 0x18d   :  { %v795_v8 = vadd.f32 %v794_v10, %v364_v47  ;;  %v844_v4 = vmax.f32 %v779_v12, %v782_v13  ;;  %v887_v31 = vmax.f32 %v839_v40, %v846_v23  ;;  %v843_v0 = vmax.f32 %v774_v26, %v779_v12  ;;  %v2469_v47 = vld [vmem:[%s3559_s2 + $0x30c] ss:$12 sps:$4 sm:$0xff]   ;;  %v2490_v13 = vld [vmem:[%s3559_s2 + $0x3b4] ss:$12 sps:$4 sm:$0xff]  }
 0x18e   :  { %2125 = vmatpush3.bf16.msra.mxu0 %v3024_v15  ;;  %2410 = vmatpush3.bf16.msra.mxu1 %v3024_v15  ;;  %v2345_v61 = vpop.f32.mrf.mxu0  ;;  %v842_v7 = vmax.f32 %v771_v36, %v774_v26  ;;  %v841_v30 = vmax.f32 %v766_v20, %v771_v36  ;;  %v2484_v20 = vld [vmem:[%s3559_s2 + $0x384] ss:$12 sps:$4 sm:$0xff]   ;;  %v2491_v23 = vld [vmem:[%s3559_s2 + $0x254] ss:$12 sps:$4 sm:$0xff]   ;;  %v2500_v12 = vld [vmem:[%s3559_s2 + $0x32c] ss:$12 sps:$4 sm:$0xff]  }
 0x18f   :  { %v847_v1 = vmax.f32 %v790_v60, %v795_v8  ;;  %2389 = vmatprep.subr.bf16.mxu0 %v2531_v2  ;;  %v885_v16 = vmax.f32 %v3092_v59, %v844_v4  ;;  %v972_v35 = vpack.c.bf16 %v887_v31, %v886_v49  ;;  %v884_v51 = vmax.f32 %v3090_v21, %v843_v0  ;;  %v2455_v21 = vld [vmem:[%s3559_s2 + $0x2b0] ss:$12 sps:$4 sm:$0xff]   ;;  %v2488_v10 = vld [vmem:[%s3559_s2 + $0x3b8] ss:$12 sps:$4 sm:$0xff]   ;;  %v2495_v25 = vld [vmem:[%s3559_s2 + $0x2b4] ss:$12 sps:$4 sm:$0xff]  }
 0x190   :  { %v797_v63 = vpop.f32.mrf.mxu0  ;;  %v883_v28 = vmax.f32 %v3098_v19, %v842_v7  ;;  %v882_v9 = vmax.f32 %v3103_v55, %v841_v30  ;;  %v880_v19 = vmax.f32 %v3083_v53, %v839_v40  ;;  %v2457_v55 = vld [vmem:[%s3559_s2 + $0x2ac] ss:$12 sps:$4 sm:$0xff]   ;;  %v2460_v53 = vld [vmem:[%s3559_s2 + $0x2c4] ss:$12 sps:$4 sm:$0xff]   ;;  %v2503_v26 = vld [vmem:[%s3559_s2 + $0x374] ss:$12 sps:$4 sm:$0xff]  }
 0x191   :  { %v888_v33 = vmax.f32 %v840_v6, %v847_v1  ;;  %1492 = vmatmul.mubr.bf16.vlgmr.msra.gmra.mxu0 %v2443_v11  ;;  %1500 = vmatmul.mubr.bf16.vlgmr.msra.gmra.mxu1 %v2446_v56  ;;  %v971_v59 = vpack.c.bf16 %v885_v16, %v884_v51  ;;  %v2479_v60 = vld [vmem:[%s3559_s2 + $0x370] ss:$12 sps:$4 sm:$0xff]   ;;  %v2492_v8 = vld [vmem:[%s3559_s2 + $0x26c] ss:$12 sps:$4 sm:$0xff]   ;;  %v2499_v6 = vld [vmem:[%s3559_s2 + $0x314] ss:$12 sps:$4 sm:$0xff]  }
 0x192   :  { %1507 = vmatprep.mubr.bf16.mxu1 %v2449_v14  ;;  %v2346_v15 = vpop.f32.mrf.mxu0  ;;  %2391 = vmatprep.mubr.msk.bf16.mxu0 %vm2533_vm1, %v2531_v2  ;;  %v2452_v2 = vld [vmem:[%s3559_s2 + $0x298] ss:$12 sps:$4 sm:$0xff]   ;;  %v970_v18 = vpack.c.bf16 %v883_v28, %v882_v9  ;;  %v969_v34 = vpack.c.bf16 %v881_v17, %v880_v19  ;;  %v2494_v56 = vld [vmem:[%s3559_s2 + $0x29c] ss:$12 sps:$4 sm:$0xff]  }
 0x193   :  { %v973_v37 = vpack.c.bf16 %v888_v33, %v888_v33  ;;  %v2493_v11 = vld [vmem:[%s3559_s2 + $0x284] ss:$12 sps:$4 sm:$0xff]   ;;  %v2496_v40 = vld [vmem:[%s3559_s2 + $0x2cc] ss:$12 sps:$4 sm:$0xff]   ;;  %v2498_v14 = vld [vmem:[%s3559_s2 + $0x2fc] ss:$12 sps:$4 sm:$0xff]  }
 0x194   :  { %v2497_v61 = vld [vmem:[%s3559_s2 + $0x2e4] ss:$12 sps:$4 sm:$0xff]   ;;  %v2502_v1 = vld [vmem:[%s3559_s2 + $0x35c] ss:$12 sps:$4 sm:$0xff]   ;;  %v2504_v63 = vld [vmem:[%s3559_s2 + $0x38c] ss:$12 sps:$4 sm:$0xff]  }
 0x195   :  { %2411 = vmatprep.subr.msk.bf16.mxu1 %vm1455_vm2, %v973_v37  ;;  %v1457_v41 = vsel %vm1455_vm2, %v973_v37, 0  ;;  %v2505_v4 = vld [vmem:[%s3559_s2 + $0x3a4] ss:$12 sps:$4 sm:$0xff]   ;;  %v2506_v31 = vld [vmem:[%s3559_s2 + $0x3bc] ss:$12 sps:$4 sm:$0xff]  }
 0x196   :  { %2348 = vmatpush3.bf16.msra.mxu1 %v1457_v41 }
 0x197   :  { %2349 = vmatprep.subr.bf16.mxu1 %v972_v35 }
 0x199   :  { %1508 = vmatmul.mubr.bf16.gmra.mxu1 %v2451_v50 }
 0x19a   :  { %2350 = vmatpush3.bf16.msra.mxu1 %v972_v35  ;;  %1515 = vmatprep.mubr.bf16.mxu1 %v2452_v2 }
 0x19b   :  { %2351 = vmatprep.subr.bf16.mxu1 %v971_v59 }
 0x19e   :  { %2352 = vmatpush3.bf16.msra.mxu1 %v971_v59 }
 0x19f   :  { %2353 = vmatprep.subr.bf16.mxu1 %v970_v18 }
 0x1a1   :  { %1516 = vmatmul.mubr.bf16.gmra.mxu1 %v2454_v45 }
 0x1a2   :  { %2354 = vmatpush3.bf16.msra.mxu1 %v970_v18  ;;  %1523 = vmatprep.mubr.bf16.mxu1 %v2455_v21 }
 0x1a3   :  { %2355 = vmatprep.subr.bf16.mxu1 %v969_v34 }
 0x1a6   :  { %2356 = vmatpush3.bf16.msra.mxu1 %v969_v34 }
 0x1a7   :  { %1903 = vmatprep.subr.bf16.mxu1 %v3562_v3 }
 0x1a9   :  { %1524 = vmatmul.mubr.bf16.gmra.mxu1 %v2457_v55 }
 0x1aa   :  { %1531 = vmatprep.mubr.bf16.mxu1 %v2458_v32 }
 0x1b1   :  { %1532 = vmatmul.mubr.bf16.gmra.mxu1 %v2460_v53 }
 0x1b2   :  { %1539 = vmatprep.mubr.bf16.mxu1 %v2461_v39 }
 0x1b9   :  { %1540 = vmatmul.mubr.bf16.gmra.mxu1 %v2463_v24 }
 0x1ba   :  { %1547 = vmatprep.mubr.bf16.mxu1 %v2464_v52 }
 0x1c1   :  { %1548 = vmatmul.mubr.bf16.gmra.mxu1 %v2466_v38 }
 0x1c2   :  { %1555 = vmatprep.mubr.bf16.mxu1 %v2467_v22 }
 0x1c9   :  { %1556 = vmatmul.mubr.bf16.gmra.mxu1 %v2469_v47 }
 0x1ca   :  { %1563 = vmatprep.mubr.bf16.mxu1 %v2470_v62 }
 0x1d1   :  { %1564 = vmatmul.mubr.bf16.gmra.mxu1 %v2472_v58 }
 0x1d2   :  { %1571 = vmatprep.mubr.bf16.mxu1 %v2473_v46  ;;  %v3330_v46 = vpop.permute.xlu1 %1078 }
 0x1d9   :  { %1572 = vmatmul.mubr.bf16.gmra.mxu1 %v2475_v27 }
 0x1da   :  { %1579 = vmatprep.mubr.bf16.mxu1 %v2476_v43 }
 0x1e1   :  { %1580 = vmatmul.mubr.bf16.gmra.mxu1 %v2478_v44 }
 0x1e2   :  { %1587 = vmatprep.mubr.bf16.mxu1 %v2479_v60  ;;  %v3334_v60 = vpop.permute.xlu0 %1083 }
 0x1e9   :  { %1588 = vmatmul.mubr.bf16.gmra.mxu1 %v2481_v42 }
 0x1ea   :  { %1595 = vmatprep.mubr.bf16.mxu1 %v2482_v29 }
 0x1f1   :  { %1596 = vmatmul.mubr.bf16.gmra.mxu1 %v2484_v20  ;;  %v3338_v20 = vpop.permute.xlu1 %1088 }
 0x1f2   :  { %1603 = vmatprep.mubr.bf16.mxu1 %v2485_v48 }
 0x1f9   :  { %1604 = vmatmul.mubr.bf16.gmra.mxu1 %v2487_v57 }
 0x1fa   :  { %1611 = vmatprep.mubr.bf16.mxu1 %v2488_v10 }
 0x201   :  { %1612 = vmatmul.mubr.bf16.gmra.mxu1 %v2490_v13  ;;  %v3342_v13 = vpop.permute.xlu0 %1093 }
 0x202   :  { %2357 = vmatprep.mubr.msk.bf16.mxu1 %vm1406_vm3, %v2491_v23 }
 0x209   :  { %2358 = vmatmul.mubr.msk.bf16.vlgmr.msra.gmra.mxu1 %vm1406_vm3, %v2492_v8  ;;  %v3344_v8 = vpop.permute.xlu1 %1118 }
 0x20a   :  { %2361 = vmatprep.mubr.msk.bf16.mxu1 %vm1406_vm3, %v2493_v11 }
 0x211   :  { %2362 = vmatmul.mubr.msk.bf16.gmra.mxu1 %vm1406_vm3, %v2494_v56 }
 0x212   :  { %2365 = vmatprep.mubr.msk.bf16.mxu1 %vm1406_vm3, %v2495_v25 }
 0x219   :  { %2366 = vmatmul.mubr.msk.bf16.gmra.mxu1 %vm1406_vm3, %v2496_v40  ;;  %v3348_v40 = vpop.permute.xlu0 %1123 }
 0x21a   :  { %2369 = vmatprep.mubr.msk.bf16.mxu1 %vm1406_vm3, %v2497_v61 }
 0x221   :  { %2370 = vmatmul.mubr.msk.bf16.gmra.mxu1 %vm1406_vm3, %v2498_v14 }
 0x222   :  { %2373 = vmatprep.mubr.msk.bf16.mxu1 %vm1406_vm3, %v2499_v6  ;;  %v3352_v6 = vpop.permute.xlu1 %1128 }
 0x223   :  { %3565 = vst [vmem:[#allocation5_spill] sm:$0xff] %v3352_v6 }
 0x229   :  { %2374 = vmatmul.mubr.msk.bf16.gmra.mxu1 %vm1406_vm3, %v2500_v12 }
 0x22a   :  { %2377 = vmatprep.mubr.msk.bf16.mxu1 %vm1406_vm3, %v2501_v5 }
 0x231   :  { %2378 = vmatmul.mubr.msk.bf16.gmra.mxu1 %vm1406_vm3, %v2502_v1 }
 0x232   :  { %2381 = vmatprep.mubr.msk.bf16.mxu1 %vm1406_vm3, %v2503_v26  ;;  %v3356_v26 = vpop.permute.xlu0 %1133 }
 0x233   :  { %3566 = vst [vmem:[#allocation6_spill] sm:$0xff] %v3356_v26 }
 0x239   :  { %2382 = vmatmul.mubr.msk.bf16.gmra.mxu1 %vm1406_vm3, %v2504_v63 }
 0x23a   :  { %2385 = vmatprep.mubr.msk.bf16.mxu1 %vm1406_vm3, %v2505_v4  ;;  %v3358_v4 = vpop.permute.xlu1 %1068 }
 0x241   :  { %2386 = vmatmul.mubr.msk.bf16.gmra.mxu1 %vm1406_vm3, %v2506_v31 }
 0x251   :  { %v2132_v33 = vpop.f32.mrf.mxu1 }
 0x253   :  { %v2133_v54 = vpop.f32.mrf.mxu1 }
 0x254   :  { %v3308_v15 = vadd.f32 %v2133_v54, %v2132_v33 }
 0x255   :  { %v2135_v36 = vpop.f32.mrf.mxu1 }
 0x257   :  { %v2136_v0 = vpop.f32.mrf.mxu1 }
 0x258   :  { %v3310_v49 = vadd.f32 %v2136_v0, %v2135_v36  ;;  %v3362_v36 = vpop.permute.xlu0 %1073 }
 0x259   :  { %v2138_v37 = vpop.f32.mrf.mxu1 }
 0x25b   :  { %v2139_v7 = vpop.f32.mrf.mxu1 }
 0x25c   :  { %v3312_v16 = vadd.f32 %v2139_v7, %v2138_v37  ;;  %v3366_v7 = vpop.permute.xlu1 %1108 }
 0x25d   :  { %v2141_v41 = vpop.f32.mrf.mxu1 }
 0x25f   :  { %v2142_v35 = vpop.f32.mrf.mxu1 }
 0x260   :  { %v3314_v50 = vadd.f32 %v2142_v35, %v2141_v41 }
 0x261   :  { %v2144_v2 = vpop.f32.mrf.mxu1 }
 0x263   :  { %v2145_v30 = vpop.f32.mrf.mxu1 }
 0x264   :  { %v3316_v51 = vadd.f32 %v2145_v30, %v2144_v2  ;;  %v3370_v30 = vpop.permute.xlu0 %1113 }
 0x265   :  { %v2147_v28 = vpop.f32.mrf.mxu1 }
 0x267   :  { %v2148_v59 = vpop.f32.mrf.mxu1 }
 0x268   :  { %v3318_v9 = vadd.f32 %v2148_v59, %v2147_v28  ;;  %v21_v59 = vld [vmem:[%s3558_s1] sm:$0x3] }
 0x269   :  { %v2150_v17 = vpop.f32.mrf.mxu1 }
 0x26b   :  { %v2151_v18 = vpop.f32.mrf.mxu1 }
 0x26c   :  { %v3320_v45 = vadd.f32 %v2151_v18, %v2150_v17  ;;  %v3375_v17 = vpop.permute.xlu1 %1058 }
 0x26d   :  { %v2153_v21 = vpop.f32.mrf.mxu1 }
 0x26f   :  { %v2154_v19 = vpop.f32.mrf.mxu1 }
 0x270   :  { %v3322_v34 = vadd.f32 %v2154_v19, %v2153_v21  ;;  %v22_v21 = vpack.c.bf16 %v21_v59, %v21_v59  ;;  %v2126_v59 = vpop.f32.mrf.mxu0 }
 0x271   :  { %v2156_v55 = vpop.f32.mrf.mxu1 }
 0x273   :  { %v2157_v32 = vpop.f32.mrf.mxu1 }
 0x274   :  { %v3324_v53 = vadd.f32 %v2157_v32, %v2156_v55  ;;  %v1851_v55 = vsel %vm1846_vm4, %v22_v21, 0 }
 0x275   :  { %v2159_v39 = vpop.f32.mrf.mxu1  ;;  %2390 = vmatpush3.bf16.xpose.msra.mxu0 %v1851_v55 }
 0x277   :  { %v2160_v24 = vpop.f32.mrf.mxu1 }
 0x278   :  { %v3326_v52 = vadd.f32 %v2160_v24, %v2159_v39  ;;  %v3379_v39 = vpop.permute.xlu0 %1063 }
 0x279   :  { %v2162_v38 = vpop.f32.mrf.mxu1 }
 0x27b   :  { %v2163_v22 = vpop.f32.mrf.mxu1 }
 0x27c   :  { %v3328_v47 = vadd.f32 %v2163_v22, %v2162_v38  ;;  %v3383_v22 = vpop.permute.xlu1 %1098 }
 0x27d   :  { %v2165_v62 = vpop.f32.mrf.mxu1 }
 0x27f   :  { %v2166_v58 = vpop.f32.mrf.mxu1 }
 0x280   :  { %v3332_v27 = vadd.f32 %v2166_v58, %v2165_v62 }
 0x281   :  { %v2168_v43 = vpop.f32.mrf.mxu1 }
 0x283   :  { %v2169_v44 = vpop.f32.mrf.mxu1 }
 0x284   :  { %v3336_v42 = vadd.f32 %v2169_v44, %v2168_v43  ;;  %v1845_v44 = vld [vmem:[%s3559_s2 + $0x3d8] sm:$0x1] }
 0x285   :  { %v2171_v29 = vpop.f32.mrf.mxu1  ;;  %2392 = vmatmul.mubr.msk.bf16.vlgmr.msra.gmra.mxu0 %vm1846_vm4, %v1845_v44 }
 0x287   :  { %v2172_v48 = vpop.f32.mrf.mxu1 }
 0x288   :  { %v3340_v57 = vadd.f32 %v2172_v48, %v2171_v29  ;;  %v3390_v29 = vpop.permute.xlu0 %1103 }
 0x289   :  { %v2174_v10 = vpop.f32.mrf.mxu1 }
 0x28b   :  { %v2175_v23 = vpop.f32.mrf.mxu1 }
 0x28c   :  { %v3346_v11 = vadd.f32 %v2175_v23, %v2174_v10  ;;  %v3392_v10 = vpop.permute.xlu1 %1048 }
 0x28d   :  { %v2177_v56 = vpop.f32.mrf.mxu1 }
 0x28f   :  { %v2178_v25 = vpop.f32.mrf.mxu1 }
 0x290   :  { %v3350_v61 = vadd.f32 %v2178_v25, %v2177_v56  ;;  %v3399_v56 = vld [vmem:[%s3559_s2 + $0x3cc] sm:$0x11]  ;;  %s2534_s2 = smov [#allocation2]  }
 0x291   :  { %v2180_v14 = vpop.f32.mrf.mxu1  ;;  %3570 = vst [vmem:[#allocation10_spill] sm:$0xff] %v3399_v56  ;;  %s1958_s30 = sshll.u32 %s2534_s2, 4  ;;  %s1959_s30 = int_to_ptr.vmem [resolvable:$true] %s1958_s30 }
 0x292   :  { %s2509_s5 = scalar_lea.vmem %s1959_s30, 16  ;;  %s2513_s6 = scalar_lea.vmem %s1959_s30, 32 }
 0x293   :  { %v2181_v12 = vpop.f32.mrf.mxu1  ;;  %p2510_p0 = scmp.ne.s32.totalorder %s1959_s30, %s2509_s5  ;;  %p2514_p1 = scmp.lt.s32.totalorder %s1959_s30, %s1959_s30 }
 0x294   :  { %v3354_v5 = vadd.f32 %v2181_v12, %v2180_v14  ;;  %v2082_v14 = vcombine.high %v3399_v56, %v3399_v56  ;;  %p2515_p2 = scmp.lt.s32.totalorder %s2513_s6, %s2509_s5 }
 0x295   :  { %v2183_v1 = vpop.f32.mrf.mxu1 }
 0x296   :  { %2083 = vmatprep.mubr.msk.bf16.mxu1 %vm1899_vm5, %v2082_v14  ;;  %p2516_p3 = por %p2515_p2, %p2514_p1 }
 0x297   :  { %v2184_v63 = vpop.f32.mrf.mxu1 }
 0x298   :  { %v3360_v31 = vadd.f32 %v2184_v63, %v2183_v1  ;;  %v3403_v1 = vpop.permute.xlu0 %1053  ;;  %p2517_p4 = pnand %p2516_p3, %p2510_p0 }
 0x299   :  { %v2186_v33 = vpop.f32.mrf.mxu1 }
 0x29b   :  { %v2187_v54 = vpop.f32.mrf.mxu1 }
 0x29c   :  { %v3364_v0 = vadd.f32 %v2187_v54, %v2186_v33  ;;  %v1039_v54 = vpop.permute.xlu1 %1038 }
 0x29d   :  { %v2189_v37 = vpop.f32.mrf.mxu1 }
 0x29f   :  { %v2190_v41 = vpop.f32.mrf.mxu1 }
 0x2a0   :  { %v3368_v35 = vadd.f32 %v2190_v41, %v2189_v37 }
 0x2a1   :  { %v2192_v2 = vpop.f32.mrf.mxu1 }
 0x2a2   :  { %3567 = vst [vmem:[#allocation7_spill] sm:$0xff] %v3368_v35 }
 0x2a3   :  { %v2193_v28 = vpop.f32.mrf.mxu1 }
 0x2a4   :  { %v3377_v18 = vadd.f32 %v2193_v28, %v2192_v2  ;;  %v1044_v28 = vpop.permute.xlu0 %1043 }
 0x2a5   :  { %v2195_v19 = vpop.f32.mrf.mxu1 }
 0x2a7   :  { %v2196_v32 = vpop.f32.mrf.mxu1 }
 0x2a8   :  { %v3381_v24 = vadd.f32 %v2196_v32, %v2195_v19  ;;  %v1029_v19 = vpop.permute.xlu1 %1028 }
 0x2a9   :  { %v2198_v38 = vpop.f32.mrf.mxu1 }
 0x2ab   :  { %v2199_v62 = vpop.f32.mrf.mxu1 }
 0x2ac   :  { %v3385_v58 = vadd.f32 %v2199_v62, %v2198_v38  ;;  %v2127_v38 = vpop.f32.mrf.mxu0 }
 0x2ad   :  { %v2201_v43 = vpop.f32.mrf.mxu1  ;;  %v2128_v56 = vadd.f32 %v2127_v38, %v2126_v59 }
 0x2ae   :  { %3568 = vst [vmem:[#allocation8_spill] sm:$0xff] %v3385_v58  ;;  %v2129_v14 = vpop.f32.mrf.mxu0 }
 0x2af   :  { %v2202_v48 = vpop.f32.mrf.mxu1 }
 0x2b0   :  { %v3394_v23 = vadd.f32 %v2202_v48, %v2201_v43  ;;  %v1034_v43 = vpop.permute.xlu0 %1033 }
 0x2b1   :  { %v2204_v25 = vpop.f32.mrf.mxu1 }
 0x2b2   :  { %3569 = vst [vmem:[#allocation9_spill] sm:$0xff] %v3394_v23  ;;  %v2130_v23 = vpop.f32.mrf.mxu0 }
 0x2b3   :  { %v2205_v12 = vpop.f32.mrf.mxu1  ;;  %v2131_v58 = vadd.f32 %v2130_v23, %v2129_v14  ;;  %v1510_v23 = vadd.f32 %v3312_v16, %v1029_v19  ;;  %v1526_v19 = vadd.f32 %v3320_v45, %v3392_v10 }
 0x2b4   :  { %v3405_v63 = vadd.f32 %v2205_v12, %v2204_v25  ;;  %v1019_v25 = vpop.permute.xlu1 %1018 }
 0x2b5   :  { %v2207_v33 = vpop.f32.mrf.mxu1 }
 0x2b6   :  { %3571 = vst [vmem:[#allocation11_spill] sm:$0xff] %v3405_v63 }
 0x2b7   :  { %v2208_v37 = vpop.f32.mrf.mxu1 }
 0x2b8   :  { %v3407_v41 = vadd.f32 %v2208_v37, %v2207_v33  ;;  %v1024_v37 = vpop.permute.xlu0 %1023 }
 0x2b9   :  { %v2210_v2 = vpop.f32.mrf.mxu1  ;;  %v1505_v63 = vadd.f32 %v3310_v49, %v1024_v37 }
 0x2ba   :  { %3572 = vst [vmem:[#allocation12_spill] sm:$0xff] %v3407_v41 }
 0x2bb   :  { %v2211_v21 = vpop.f32.mrf.mxu1 }
 0x2bc   :  { %v3409_v55 = vadd.f32 %v2211_v21, %v2210_v2  ;;  %v1502_v2 = vadd.f32 %v3308_v15, %v1019_v25  ;;  %v1009_v21 = vpop.permute.xlu1 %1008  ;;  %v1518_v25 = vadd.f32 %v3316_v51, %v1039_v54  ;;  %v1534_v54 = vadd.f32 %v3324_v53, %v3375_v17 }
 0x2bd   :  { %v2213_v32 = vpop.f32.mrf.mxu1 }
 0x2be   :  { %3573 = vst [vmem:[#allocation13_spill] sm:$0xff] %v3409_v55 }
 0x2bf   :  { %v2214_v62 = vpop.f32.mrf.mxu1 }
 0x2c0   :  { %v3411_v44 = vadd.f32 %v2214_v62, %v2213_v32  ;;  %v1494_v62 = vadd.f32 %v2128_v56, %v1009_v21 }
 0x2c1   :  { %v2216_v48 = vpop.f32.mrf.mxu1 }
 0x2c2   :  { %3574 = vst [vmem:[#allocation14_spill] sm:$0xff] %v3411_v44 }
 0x2c3   :  { %v2217_v12 = vpop.f32.mrf.mxu1 }
 0x2c4   :  { %v3413_v3 = vadd.f32 %v2217_v12, %v2216_v48  ;;  %v1014_v48 = vpop.permute.xlu0 %1013 }
 0x2c5   :  { %v2219_v33 = vpop.f32.mrf.mxu1  ;;  %v1497_v59 = vadd.f32 %v2131_v58, %v1014_v48  ;;  %v1513_v58 = vadd.f32 %v3314_v50, %v1034_v43 }
 0x2c6   :  { %3575 = vst [vmem:[#allocation15_spill] sm:$0xff] %v3413_v3 }
 0x2c7   :  { %v2220_v26 = vpop.f32.mrf.mxu1 }
 0x2c8   :  { %v3415_v41 = vadd.f32 %v2220_v26, %v2219_v33 }
 0x2c9   :  { %v2359_v55 = vpop.f32.mrf.mxu1 }
 0x2ca   :  { %v1663_v32 = vadd.f32 %v2359_v55, %v1502_v2 }
 0x2cb   :  { %v1654_v44 = vpop.f32.mrf.mxu1 }
 0x2cc   :  { %v1655_v6 = vadd.f32 %v1654_v44, %v1494_v62 }
 0x2cd   :  { %v2360_v12 = vpop.f32.mrf.mxu1 }
 0x2ce   :  { %v1781_v3 = vmax.f32 %v1655_v6, %v1663_v32  ;;  %v3419_v35 = vadd.f32 %v2360_v12, %v1505_v63  ;;  %v1521_v63 = vadd.f32 %v3318_v9, %v1044_v28  ;;  %v1537_v12 = vadd.f32 %v3326_v52, %v3379_v39 }
 0x2cf   :  { %v1657_v38 = vpop.f32.mrf.mxu1 }
 0x2d0   :  { %v1658_v26 = vadd.f32 %v1657_v38, %v1497_v59 }
 0x2d1   :  { %v2363_v33 = vpop.f32.mrf.mxu1 }
 0x2d2   :  { %v1782_v15 = vmax.f32 %v1658_v26, %v3419_v35  ;;  %v3424_v55 = vadd.f32 %v2363_v33, %v1518_v25  ;;  %v1550_v33 = vadd.f32 %v3336_v42, %v3330_v46  ;;  %v1542_v25 = vadd.f32 %v3328_v47, %v3358_v4 }
 0x2d3   :  { %v1670_v56 = vpop.f32.mrf.mxu1  ;;  %v1553_v46 = vadd.f32 %v3340_v57, %v3334_v60  ;;  %v1558_v60 = vadd.f32 %v3346_v11, %v3338_v20 }
 0x2d4   :  { %v1671_v44 = vadd.f32 %v1670_v56, %v1510_v23 }
 0x2d5   :  { %v2364_v49 = vpop.f32.mrf.mxu1 }
 0x2d6   :  { %v1783_v14 = vmax.f32 %v1663_v32, %v1671_v44  ;;  %v1785_v6 = vmax.f32 %v1671_v44, %v3424_v55  ;;  %v3429_v2 = vadd.f32 %v2364_v49, %v1521_v63 }
 0x2d7   :  { %v1673_v37 = vpop.f32.mrf.mxu1 }
 0x2d8   :  { %v1674_v21 = vadd.f32 %v1673_v37, %v1513_v58  ;;  %v1566_v58 = vadd.f32 %v3354_v5, %v3383_v22  ;;  %v1561_v5 = vadd.f32 %v3350_v61, %v3342_v13  ;;  %v1582_v61 = vadd.f32 %v3377_v18, %v3344_v8 }
 0x2d9   :  { %v2367_v62 = vpop.f32.mrf.mxu1 }
 0x2da   :  { %v1784_v51 = vmax.f32 %v3419_v35, %v1674_v21  ;;  %v1786_v16 = vmax.f32 %v1674_v21, %v3429_v2  ;;  %v1695_v48 = vadd.f32 %v2367_v62, %v1534_v54  ;;  %v1529_v35 = vadd.f32 %v3322_v34, %v3403_v1  ;;  %v3484_v21 = vpop.permute.xlu1 %1148 }
 0x2db   :  { %v1686_v32 = vpop.f32.mrf.mxu1  ;;  %v1569_v62 = vadd.f32 %v3360_v31, %v3390_v29 }
 0x2dc   :  { %v1687_v9 = vadd.f32 %v1686_v32, %v1526_v19  ;;  %v3494_v19 = vpop.permute.xlu0 %1153 }
 0x2dd   :  { %v2368_v28 = vpop.f32.mrf.mxu1 }
 0x2de   :  { %v1787_v50 = vmax.f32 %v3424_v55, %v1687_v9  ;;  %v3438_v43 = vmax.f32 %v1687_v9, %v1695_v48  ;;  %v1698_v17 = vadd.f32 %v2368_v28, %v1537_v12  ;;  %v1574_v12 = vadd.f32 %v3364_v0, %v3366_v7 }
 0x2df   :  { %v1689_v59 = vpop.f32.mrf.mxu1 }
 0x2e0   :  { %v3445_v53 = vmax.f32 %v1781_v3, %v3438_v43  ;;  %v1690_v45 = vadd.f32 %v1689_v59, %v1529_v35  ;;  %v1545_v3 = vadd.f32 %v3332_v27, %v3362_v36  ;;  %v1159_v35 = vpop.permute.xlu1 %1158 }
 0x2e1   :  { %v2371_v10 = vpop.f32.mrf.mxu1 }
 0x2e2   :  { %v1788_v38 = vmax.f32 %v3429_v2, %v1690_v45  ;;  %v1790_v26 = vmax.f32 %v1690_v45, %v1698_v17  ;;  %v1711_v34 = vadd.f32 %v2371_v10, %v1550_v33 }
 0x2e3   :  { %v1702_v52 = vpop.f32.mrf.mxu1 }
 0x2e4   :  { %v3452_v39 = vmax.f32 %v1782_v15, %v1790_v26  ;;  %v1703_v1 = vadd.f32 %v1702_v52, %v1542_v25  ;;  %v3576_v25 = vld [vmem:[#allocation7_spill] sm:$0xff] }
 0x2e5   :  { %v2372_v23 = vpop.f32.mrf.mxu1  ;;  %v1577_v52 = vadd.f32 %v3576_v25, %v3370_v30  ;;  %v3577_v30 = vld [vmem:[#allocation11_spill] sm:$0xff] }
 0x2e6   :  { %v1834_v56 = vpack.c.bf16 %v3452_v39, %v3445_v53  ;;  %v3458_v55 = vmax.f32 %v1695_v48, %v1703_v1  ;;  %v3460_v44 = vmax.f32 %v1703_v1, %v1711_v34  ;;  %v1714_v15 = vadd.f32 %v2372_v23, %v1553_v46 }
 0x2e7   :  { %v1705_v47 = vpop.f32.mrf.mxu1 }
 0x2e8   :  { %v3465_v42 = vmax.f32 %v1783_v14, %v3458_v55  ;;  %v3468_v4 = vmax.f32 %v1785_v6, %v3460_v44  ;;  %v1706_v49 = vadd.f32 %v1705_v47, %v1545_v3 }
 0x2e9   :  { %v2375_v27 = vpop.f32.mrf.mxu1 }
 0x2ea   :  { %v3470_v36 = vmax.f32 %v1698_v17, %v1706_v49  ;;  %v3472_v63 = vmax.f32 %v1706_v49, %v1714_v15  ;;  %v1727_v37 = vadd.f32 %v2375_v27, %v1566_v58  ;;  %v3578_v49 = vld [vmem:[#allocation5_spill] sm:$0xff]  ;;  %v3579_v27 = vld [vmem:[#allocation8_spill] sm:$0xff] }
 0x2eb   :  { %v1718_v57 = vpop.f32.mrf.mxu1  ;;  %v1590_v58 = vadd.f32 %v3579_v27, %v3578_v49 }
 0x2ec   :  { %v3479_v14 = vmax.f32 %v1784_v51, %v3470_v36  ;;  %v3482_v6 = vmax.f32 %v1786_v16, %v3472_v63  ;;  %v1719_v2 = vadd.f32 %v1718_v57, %v1558_v60 }
 0x2ed   :  { %v2376_v54 = vpop.f32.mrf.mxu1 }
 0x2ee   :  { %v1835_v20 = vpack.c.bf16 %v3479_v14, %v3465_v42  ;;  %v1836_v11 = vpack.c.bf16 %v3482_v6, %v3468_v4  ;;  %v1795_v22 = vmax.f32 %v1711_v34, %v1719_v2  ;;  %v1797_v51 = vmax.f32 %v1719_v2, %v1727_v37  ;;  %v1164_v34 = vpop.permute.xlu0 %1163  ;;  %v3587_v4 = vld [vmem:[#allocation10_spill] sm:$0xff] }
 0x2ef   :  { %v1721_v16 = vpop.f32.mrf.mxu1  ;;  %v1730_v31 = vadd.f32 %v2376_v54, %v1569_v62  ;;  %v2081_v6 = vcombine.low %v3587_v4, %v3587_v4 }
 0x2f0   :  { %v3496_v32 = vmax.f32 %v1787_v50, %v1795_v22  ;;  %v1819_v48 = vmax.f32 %v3438_v43, %v1797_v51  ;;  %v1722_v29 = vadd.f32 %v1721_v16, %v1561_v5  ;;  %v1585_v43 = vadd.f32 %v3381_v24, %v3348_v40  ;;  %v1139_v40 = vpop.permute.xlu1 %1138  ;;  %v3581_v16 = vld [vmem:[#allocation6_spill] sm:$0xff] }
 0x2f1   :  { %v2379_v9 = vpop.f32.mrf.mxu1 }
 0x2f2   :  { %v1796_v28 = vmax.f32 %v1714_v15, %v1722_v29  ;;  %v1798_v13 = vmax.f32 %v1722_v29, %v1730_v31  ;;  %v1743_v50 = vadd.f32 %v2379_v9, %v1582_v61  ;;  %v1598_v15 = vadd.f32 %v3577_v30, %v1139_v40  ;;  %v1144_v57 = vpop.permute.xlu0 %1143 }
 0x2f3   :  { %v1734_v59 = vpop.f32.mrf.mxu1 }
 0x2f4   :  { %v3503_v17 = vmax.f32 %v1788_v38, %v1796_v28  ;;  %v1820_v45 = vmax.f32 %v1790_v26, %v1798_v13  ;;  %v1735_v10 = vadd.f32 %v1734_v59, %v1574_v12  ;;  %v1947_v39 = vpop.permute.xlu1 %1946 }
 0x2f5   :  { %v2380_v33 = vpop.f32.mrf.mxu1 }
 0x2f6   :  { %v1837_v8 = vpack.c.bf16 %v3503_v17, %v3496_v32  ;;  %v3511_v18 = vpack.c.bf16 %v1820_v45, %v1819_v48  ;;  %v1799_v0 = vmax.f32 %v1727_v37, %v1735_v10  ;;  %v1801_v7 = vmax.f32 %v1735_v10, %v1743_v50  ;;  %v3582_v48 = vld [vmem:[#allocation9_spill] sm:$0xff] }
 0x2f7   :  { %v1737_v38 = vpop.f32.mrf.mxu1  ;;  %v1746_v23 = vadd.f32 %v2380_v33, %v1585_v43 }
 0x2f8   :  { %v1821_v26 = vmax.f32 %v3458_v55, %v1799_v0  ;;  %v1823_v1 = vmax.f32 %v3460_v44, %v1801_v7  ;;  %v1738_v3 = vadd.f32 %v1737_v38, %v1577_v52  ;;  %v3580_v44 = vld [vmem:[#allocation12_spill] sm:$0xff]  ;;  %v3583_v52 = vld [vmem:[#allocation15_spill] sm:$0xff] }
 0x2f9   :  { %v2383_v24 = vpop.f32.mrf.mxu1  ;;  %v1601_v54 = vadd.f32 %v3580_v44, %v1144_v57  ;;  %v1614_v38 = vadd.f32 %v3583_v52, %v1159_v35 }
 0x2fa   :  { %v1800_v46 = vmax.f32 %v1730_v31, %v1738_v3  ;;  %v1802_v47 = vmax.f32 %v1738_v3, %v1746_v23  ;;  %v1759_v55 = vadd.f32 %v2383_v24, %v1598_v15  ;;  %v1593_v31 = vadd.f32 %v3582_v48, %v3581_v16  ;;  %v3584_v3 = vld [vmem:[#allocation13_spill] sm:$0xff] }
 0x2fb   :  { %v1750_v60 = vpop.f32.mrf.mxu1  ;;  %v1606_v40 = vadd.f32 %v3584_v3, %v3484_v21 }
 0x2fc   :  { %v1822_v37 = vmax.f32 %v3470_v36, %v1800_v46  ;;  %v1824_v2 = vmax.f32 %v3472_v63, %v1802_v47  ;;  %v1751_v62 = vadd.f32 %v1750_v60, %v1590_v58 }
 0x2fd   :  { %v2384_v5 = vpop.f32.mrf.mxu1 }
 0x2fe   :  { %v1839_v29 = vpack.c.bf16 %v1822_v37, %v1821_v26  ;;  %v1840_v9 = vpack.c.bf16 %v1824_v2, %v1823_v1  ;;  %v1803_v61 = vmax.f32 %v1743_v50, %v1751_v62  ;;  %v1805_v12 = vmax.f32 %v1751_v62, %v1759_v55 }
 0x2ff   :  { %v1753_v59 = vpop.f32.mrf.mxu1  ;;  %v1762_v43 = vadd.f32 %v2384_v5, %v1601_v54  ;;  %v1617_v50 = vadd.f32 %v3415_v41, %v1164_v34 }
 0x300   :  { %v1825_v45 = vmax.f32 %v1795_v22, %v1803_v61  ;;  %v1827_v10 = vmax.f32 %v1797_v51, %v1805_v12  ;;  %v1754_v33 = vadd.f32 %v1753_v59, %v1593_v31  ;;  %v3585_v22 = vld [vmem:[#allocation14_spill] sm:$0xff] }
 0x301   :  { %v2387_v36 = vpop.f32.mrf.mxu1  ;;  %v1609_v51 = vadd.f32 %v3585_v22, %v3494_v19 }
 0x302   :  { %v1804_v25 = vmax.f32 %v1746_v23, %v1754_v33  ;;  %v1806_v63 = vmax.f32 %v1754_v33, %v1762_v43  ;;  %v1775_v26 = vadd.f32 %v2387_v36, %v1614_v38 }
 0x303   :  { %v1766_v24 = vpop.f32.mrf.mxu1 }
 0x304   :  { %v1826_v30 = vmax.f32 %v1796_v28, %v1804_v25  ;;  %v1828_v15 = vmax.f32 %v1798_v13, %v1806_v63  ;;  %v1767_v1 = vadd.f32 %v1766_v24, %v1606_v40  ;;  %v3586_v28 = vmov 0  }
 0x305   :  { %v2388_v49 = vpop.f32.mrf.mxu1 }
 0x306   :  { %v1841_v27 = vpack.c.bf16 %v1826_v30, %v1825_v45  ;;  %v1842_v58 = vpack.c.bf16 %v1828_v15, %v1827_v10  ;;  %v1807_v23 = vmax.f32 %v1759_v55, %v1767_v1  ;;  %v1809_v60 = vmax.f32 %v1767_v1, %v1775_v26 }
 0x307   :  { %v1769_v57 = vpop.f32.mrf.mxu1  ;;  %v1778_v2 = vadd.f32 %v2388_v49, %v1617_v50 }
 0x308   :  { %v1829_v35 = vmax.f32 %v1799_v0, %v1807_v23  ;;  %v1831_v37 = vmax.f32 %v1801_v7, %v1809_v60  ;;  %v1770_v21 = vadd.f32 %v1769_v57, %v1609_v51  ;;  %1904 = vmatpush1.bf16.msra.mxu1 %v1841_v27 }
 0x309   :  { %1905 = vmatprep.subr.bf16.mxu1 %v3586_v28 }
 0x30a   :  { %v1808_v13 = vmax.f32 %v1762_v43, %v1770_v21  ;;  %v1810_v62 = vmax.f32 %v1770_v21, %v1778_v2 }
 0x30c   :  { %v1830_v44 = vmax.f32 %v1800_v46, %v1808_v13  ;;  %v1832_v41 = vmax.f32 %v1802_v47, %v1810_v62  ;;  %1906 = vmatpush1.bf16.msra.mxu1 %v1840_v9 }
 0x30d   :  { %1907 = vmatprep.subr.bf16.mxu1 %v3586_v28 }
 0x30e   :  { %v1843_v19 = vpack.c.bf16 %v1830_v44, %v1829_v35  ;;  %v1844_v34 = vpack.c.bf16 %v1832_v41, %v1831_v37 }
 0x310   :  { %1908 = vmatpush1.bf16.msra.mxu1 %v1839_v29 }
 0x311   :  { %1909 = vmatprep.subr.bf16.mxu1 %v3586_v28 }
 0x314   :  { %1910 = vmatpush1.bf16.msra.mxu1 %v3511_v18 }
 0x315   :  { %1911 = vmatprep.subr.bf16.mxu1 %v3586_v28 }
 0x318   :  { %1912 = vmatpush1.bf16.msra.mxu1 %v1837_v8 }
 0x319   :  { %1913 = vmatprep.subr.bf16.mxu1 %v3586_v28 }
 0x31c   :  { %1914 = vmatpush1.bf16.msra.mxu1 %v1836_v11 }
 0x31d   :  { %1915 = vmatprep.subr.bf16.mxu1 %v3586_v28 }
 0x320   :  { %1916 = vmatpush1.bf16.msra.mxu1 %v1835_v20 }
 0x321   :  { %1917 = vmatprep.subr.bf16.mxu1 %v3586_v28 }
 0x324   :  { %1918 = vmatpush1.bf16.msra.mxu1 %v1834_v56 }
 0x325   :  { %1929 = vmatprep.subr.bf16.mxu1 %v3586_v28 }
 0x328   :  { %1930 = vmatpush2.bf16.msra.mxu1 %v1844_v34 }
 0x329   :  { %1931 = vmatprep.subr.bf16.mxu1 %v3586_v28 }
 0x32c   :  { %1932 = vmatpush2.bf16.msra.mxu1 %v1843_v19 }
 0x32d   :  { %1933 = vmatprep.subr.bf16.mxu1 %v3586_v28 }
 0x330   :  { %1934 = vmatpush2.bf16.msra.mxu1 %v1842_v58 }
 0x333   :  { %1936 = vmatmul.mubr.bf16.vlgmr.msra.gmra.mxu1 %v2081_v6 }
 0x345   :  { %v1887_v42 = vpop.f32.mrf.mxu0 }
 0x347   :  { %v2393_v14 = vpop.f32.mrf.mxu0 }
 0x349   :  { %v1890_v20 = vpop.f32.mrf.mxu0 }
 0x34b   :  { %v2394_v11 = vpop.f32.mrf.mxu0 }
 0x3f3   :  { %v1937_v32 = vpop.f32.mrf.mxu1 }
 0x3f4   :  { %v1938_v53 = vadd.f32 %v1937_v32, %v1887_v42 }
 0x3f5   :  { %v1939_v56 = vpop.f32.mrf.mxu1 }
 0x3f6   :  { %v1949_v17 = vadd.f32 %v1947_v39, %v1938_v53 }
 0x3f7   :  { %v1940_v8 = vpop.f32.mrf.mxu1 }
 0x3f8   :  { %1951 = vst.msk [vmem:[#allocation2] sm:$0x1] %vm1950_vm6, %v1949_v17 }
 0x3f9   :  { %v1941_v18 = vpop.f32.mrf.mxu1 }
 0x3fa   :  { %2520 = shalt.err (!%p2517_p4)
}
 0x3fb   :  { %1961 = dma.vmem_to_hbm [thread:$0]  %s1959_s30, 16, %s3561_s4, [#allocation3]  }
 0x3fc   :  { %2529 = dma.done.wait [#allocation3], 16  }
 0x3fd   :  { %2530 = vsyncadd [#allocation3], 4294967280 }
 0x3fe   :  { %1965 = vsyncpa [#allocation3], 1 }

</bundles_post_ra>
